<compile_context>
chip_gen: v5e
topology: v5e:2x2
jax: 0.10.0
libtpu: 0.0.40
codegen_flags: <defaults>
</compile_context>

<pallas_src>
import math
import jax
import jax.numpy as jnp
from jax.experimental import pallas as pl
from jax.experimental.pallas import tpu as pltpu

# ----- scaled-down "BERT" config (real co-condenser is 768/12/12) -----
VOCAB = 128
SEQ = 8
HIDDEN = 32
HEADS = 4
HEAD_DIM = HIDDEN // HEADS
FFN = 64
LAYERS = 2
EPS = 1e-12

# rows of the packed per-layer vector slab (LAYERS, 8, HIDDEN)
_BO, _B2, _LN1G, _LN1B, _LN2G, _LN2B = 0, 1, 2, 3, 4, 5


# ---------------------------------------------------------------- helpers ---
def _layernorm(x, gamma, beta):
    mu = jnp.mean(x, axis=-1, keepdims=True)
    var = jnp.mean((x - mu) ** 2, axis=-1, keepdims=True)
    return (x - mu) * jax.lax.rsqrt(var + EPS) * gamma + beta


def _gelu(x):
    # TODO(synk): HF BERT/co-condenser uses exact erf-GELU; tanh approximation
    # is used here (EUP-friendly, matches within ~1e-3).
    return 0.5 * x * (1.0 + jnp.tanh(0.7978845608028654 * (x + 0.044715 * x * x * x)))


# ----------------------------------------------------------------- kernel ---
def encoder_stack_kernel(x_ref, mask_ref, emb_ln_ref,
                         wqkv_ref, bqkv_ref, wo_ref,
                         w1_ref, b1_ref, w2_ref, vecs_ref,
                         o_ref):
    # One batch item per grid step; the full stack is fused into this body.
    emb = emb_ln_ref[...]                                  # (2, H) f32
    x = _layernorm(x_ref[0], emb[0:1], emb[1:2])           # (S, H) f32

    # Hoisted once per block: additive key-mask bias, reused across layers/heads.
    bias = (1.0 - mask_ref[0]) * (-1e9)                    # (1, S) f32
    scale = 1.0 / math.sqrt(HEAD_DIM)

    for l in range(LAYERS):                                # static unroll; weights stay in VMEM
        wqkv = wqkv_ref[l]                                 # (3, HEADS, H, D) bf16
        bqkv = bqkv_ref[l]                                 # (3, HEADS, 1, D) f32
        vecs = vecs_ref[l]                                 # (8, H) f32

        # --- multi-head attention: head axis batched, no transposes/concat ---
        xb = jnp.broadcast_to(x.astype(jnp.bfloat16), (HEADS, SEQ, HIDDEN))
        q = jnp.einsum('hsk,hkd->hsd', xb, wqkv[0],
                       preferred_element_type=jnp.float32) + bqkv[0]   # (HEADS, S, D)
        k = jnp.einsum('hsk,hkd->hsd', xb, wqkv[1],
                       preferred_element_type=jnp.float32) + bqkv[1]
        v = jnp.einsum('hsk,hkd->hsd', xb, wqkv[2],
                       preferred_element_type=jnp.float32) + bqkv[2]

        s = jnp.einsum('hqd,hkd->hqk',
                       q.astype(jnp.bfloat16), k.astype(jnp.bfloat16),
                       preferred_element_type=jnp.float32) * scale + bias  # (HEADS, S, S)
        s = s - jnp.max(s, axis=-1, keepdims=True)
        p = jnp.exp(s)
        p = p * pl.reciprocal(jnp.sum(p, axis=-1, keepdims=True), approx=True)

        ctx = jnp.einsum('hqk,hkd->hqd',
                         p.astype(jnp.bfloat16), v.astype(jnp.bfloat16),
                         preferred_element_type=jnp.float32)               # (HEADS, S, D)

        # output projection: per-head (S,D)@(D,H) summed over heads == concat(ctx) @ Wo
        proj = jnp.einsum('hsd,hdk->hsk',
                          ctx.astype(jnp.bfloat16), wo_ref[l],
                          preferred_element_type=jnp.float32)              # (HEADS, S, H)
        attn = jnp.sum(proj, axis=0) + vecs[_BO:_BO + 1]                   # (S, H)

        h1 = _layernorm(x + attn, vecs[_LN1G:_LN1G + 1], vecs[_LN1B:_LN1B + 1])

        # --- FFN ---
        f = jnp.dot(h1.astype(jnp.bfloat16), w1_ref[l],
                    preferred_element_type=jnp.float32) + b1_ref[l]        # (S, FFN)
        f = _gelu(f)
        f = jnp.dot(f.astype(jnp.bfloat16), w2_ref[l],
                    preferred_element_type=jnp.float32) + vecs[_B2:_B2 + 1]

        x = _layernorm(h1 + f, vecs[_LN2G:_LN2G + 1], vecs[_LN2B:_LN2B + 1])

    o_ref[0] = x


# --------------------------------------------------------------- wrappers ---
def _rep(shape):
    n = len(shape)
    return pl.BlockSpec(shape, lambda b, _n=n: (0,) * _n)


def pallas_encoder_stack(x, mask3, packed):
    B, S, H = x.shape
    ws = [packed["emb_ln"], packed["wqkv"], packed["bqkv"], packed["wo"],
          packed["w1"], packed["b1"], packed["w2"], packed["vecs"]]
    in_specs = [pl.BlockSpec((1, S, H), lambda b: (b, 0, 0)),
                pl.BlockSpec((1, 1, S), lambda b: (b, 0, 0))]
    in_specs += [_rep(w.shape) for w in ws]
    return pl.pallas_call(
        encoder_stack_kernel,
        out_shape=jax.ShapeDtypeStruct((B, S, H), jnp.float32),
        grid=(B,),
        in_specs=in_specs,
        out_specs=pl.BlockSpec((1, S, H), lambda b: (b, 0, 0)),
        compiler_params=pltpu.CompilerParams(dimension_semantics=("parallel",)),
    )(x, mask3, *ws)


# ------------------------------------------------------------ parameters ---
def init_params(key):
    def nrm(k, shape):
        return 0.02 * jax.random.normal(k, shape, jnp.float32)

    keys = jax.random.split(key, 3 + LAYERS * 6)
    params = {
        "word_emb": nrm(keys[0], (VOCAB, HIDDEN)),
        "pos_emb": nrm(keys[1], (SEQ, HIDDEN)),
        "type_emb": nrm(keys[2], (2, HIDDEN)),            # token_type_ids default 0
    }

    def split_out(w):  # (H, H) -> (HEADS, H, HEAD_DIM), head h == w[:, h*D:(h+1)*D]
        return w.reshape(HIDDEN, HEADS, HEAD_DIM).transpose(1, 0, 2)

    wqkv, bqkv, wo, w1, b1, w2, vecs = [], [], [], [], [], [], []
    ki = 3
    for _ in range(LAYERS):
        wq = nrm(keys[ki + 0], (HIDDEN, HIDDEN))
        wk = nrm(keys[ki + 1], (HIDDEN, HIDDEN))
        wv = nrm(keys[ki + 2], (HIDDEN, HIDDEN))
        wo_l = nrm(keys[ki + 3], (HIDDEN, HIDDEN))
        w1_l = nrm(keys[ki + 4], (HIDDEN, FFN))
        w2_l = nrm(keys[ki + 5], (FFN, HIDDEN))
        ki += 6

        wqkv.append(jnp.stack([split_out(wq), split_out(wk), split_out(wv)]))
        bqkv.append(jnp.zeros((3, HEADS, 1, HEAD_DIM), jnp.float32))
        wo.append(wo_l.reshape(HEADS, HEAD_DIM, HIDDEN))   # head h == wo[h*D:(h+1)*D, :]
        w1.append(w1_l)
        b1.append(jnp.zeros((1, FFN), jnp.float32))
        w2.append(w2_l)
        # packed per-layer vectors: [bo, b2, ln1_g, ln1_b, ln2_g, ln2_b, pad, pad]
        v = jnp.zeros((8, HIDDEN), jnp.float32)
        v = v.at[_LN1G].set(1.0).at[_LN2G].set(1.0)
        vecs.append(v)

    params["packed"] = {
        "emb_ln": jnp.concatenate([jnp.ones((1, HIDDEN), jnp.float32),
                                   jnp.zeros((1, HIDDEN), jnp.float32)], axis=0),
        "wqkv": jnp.stack(wqkv).astype(jnp.bfloat16),      # (L, 3, HEADS, H, D)
        "bqkv": jnp.stack(bqkv),                           # (L, 3, HEADS, 1, D) f32
        "wo": jnp.stack(wo).astype(jnp.bfloat16),          # (L, HEADS, D, H)
        "w1": jnp.stack(w1).astype(jnp.bfloat16),          # (L, H, FFN)
        "b1": jnp.stack(b1),                               # (L, 1, FFN) f32
        "w2": jnp.stack(w2).astype(jnp.bfloat16),          # (L, FFN, H)
        "vecs": jnp.stack(vecs),                           # (L, 8, H) f32
    }
    return params


# ---------------------------------------------------------- forward (glue) ---
def embedder_forward(params, input_ids, attn_masks):
    # TODO(synk): pretrained weight loading (AutoModel.from_pretrained) has no Pallas
    # equivalent; weights are deterministic synthetic initializations.  At real
    # co-condenser dims (30k x 768) the embedding table should stay HBM-resident
    # (memory_space=pl.ANY + per-row DMA gather) rather than be pulled into VMEM.
    x = (params["word_emb"][input_ids]
         + params["pos_emb"][None, :, :]
         + params["type_emb"][0][None, None, :])            # (B, S, H), token_type=0
    mask3 = attn_masks.astype(jnp.float32)[:, None, :]       # (B, 1, S)
    h = pallas_encoder_stack(x, mask3, params["packed"])     # (B, S, H)
    return h[:, 0, :]                                        # CLS pooling, (B, H)


# --------------------------------------------------------------------- main --
if __name__ == "__main__":
    key = jax.random.PRNGKey(0)
    pkey, ikey = jax.random.split(key)
    params = init_params(pkey)

    input_ids = jax.random.randint(ikey, (2, SEQ), 0, VOCAB, dtype=jnp.int32)
    attn_masks = jnp.ones((2, SEQ), jnp.int32).at[1, SEQ - 2:].set(0)  # pad tail of item 1

    out = embedder_forward(params, input_ids, attn_masks)
    out = jax.block_until_ready(out)
    assert out.shape == (2, HIDDEN) and out.dtype == jnp.float32
    print("KERNEL_OK")
</pallas_src>

<mosaic_0001>
module attributes {stable_mosaic.version = 11 : i64} {
  func.func @encoder_stack_kernel(%arg0: i32, %arg1: memref<1x8x32xf32, #tpu.memory_space<vmem>>, %arg2: memref<1x1x8xf32, #tpu.memory_space<vmem>>, %arg3: memref<2x32xf32, #tpu.memory_space<vmem>>, %arg4: memref<2x3x4x32x8xbf16, #tpu.memory_space<vmem>>, %arg5: memref<2x3x4x1x8xf32, #tpu.memory_space<vmem>>, %arg6: memref<2x4x8x32xbf16, #tpu.memory_space<vmem>>, %arg7: memref<2x32x64xbf16, #tpu.memory_space<vmem>>, %arg8: memref<2x1x64xf32, #tpu.memory_space<vmem>>, %arg9: memref<2x64x32xbf16, #tpu.memory_space<vmem>>, %arg10: memref<2x8x32xf32, #tpu.memory_space<vmem>>, %arg11: memref<1x8x32xf32, #tpu.memory_space<vmem>>) attributes {dimension_semantics = [#tpu.dimension_semantics<parallel>], iteration_bounds = array<i64: 2>, scalar_prefetch = 0 : i64, scratch_operands = 0 : i64, tpu.core_type = #tpu.core_type<tc>, window_params = [{transform_indices = @transform_0, window_bounds = array<i64: 1, 8, 32>}, {transform_indices = @transform_1, window_bounds = array<i64: 1, 1, 8>}, {pipeline_mode = #tpu.pipeline_mode<synchronous>, transform_indices = @transform_2, window_bounds = array<i64: 2, 32>}, {pipeline_mode = #tpu.pipeline_mode<synchronous>, transform_indices = @transform_3, window_bounds = array<i64: 2, 3, 4, 32, 8>}, {pipeline_mode = #tpu.pipeline_mode<synchronous>, transform_indices = @transform_4, window_bounds = array<i64: 2, 3, 4, 1, 8>}, {pipeline_mode = #tpu.pipeline_mode<synchronous>, transform_indices = @transform_5, window_bounds = array<i64: 2, 4, 8, 32>}, {pipeline_mode = #tpu.pipeline_mode<synchronous>, transform_indices = @transform_6, window_bounds = array<i64: 2, 32, 64>}, {pipeline_mode = #tpu.pipeline_mode<synchronous>, transform_indices = @transform_7, window_bounds = array<i64: 2, 1, 64>}, {pipeline_mode = #tpu.pipeline_mode<synchronous>, transform_indices = @transform_8, window_bounds = array<i64: 2, 64, 32>}, {pipeline_mode = #tpu.pipeline_mode<synchronous>, transform_indices = @transform_9, window_bounds = array<i64: 2, 8, 32>}, {transform_indices = @transform_10, window_bounds = array<i64: 1, 8, 32>}]} {
    %c0 = arith.constant 0 : index
    %c0_0 = arith.constant 0 : index
    %0 = vector.load %arg3[%c0, %c0_0] : memref<2x32xf32, #tpu.memory_space<vmem>>, vector<2x32xf32>
    %c0_1 = arith.constant 0 : index
    %c0_2 = arith.constant 0 : index
    %c0_3 = arith.constant 0 : index
    %1 = vector.load %arg1[%c0_1, %c0_2, %c0_3] : memref<1x8x32xf32, #tpu.memory_space<vmem>>, vector<1x8x32xf32>
    %2 = vector.shape_cast %1 : vector<1x8x32xf32> to vector<8x32xf32>
    %3 = vector.extract_strided_slice %0 {offsets = [0, 0], sizes = [1, 32], strides = [1, 1]} : vector<2x32xf32> to vector<1x32xf32>
    %4 = vector.extract_strided_slice %0 {offsets = [1, 0], sizes = [1, 32], strides = [1, 1]} : vector<2x32xf32> to vector<1x32xf32>
    %cst = arith.constant dense<0.000000e+00> : vector<8xf32>
    %5 = vector.multi_reduction <add>, %2, %cst [1] : vector<8x32xf32> to vector<8xf32>
    %6 = vector.shape_cast %5 : vector<8xf32> to vector<8x1xf32>
    %cst_4 = arith.constant 3.200000e+01 : f32
    %7 = vector.broadcast %cst_4 : f32 to vector<8x1xf32>
    %8 = arith.divf %6, %7 : vector<8x1xf32>
    %9 = vector.broadcast %8 : vector<8x1xf32> to vector<8x32xf32>
    %10 = arith.subf %2, %9 : vector<8x32xf32>
    %11 = arith.mulf %10, %10 : vector<8x32xf32>
    %cst_5 = arith.constant dense<0.000000e+00> : vector<8xf32>
    %12 = vector.multi_reduction <add>, %11, %cst_5 [1] : vector<8x32xf32> to vector<8xf32>
    %13 = vector.shape_cast %12 : vector<8xf32> to vector<8x1xf32>
    %cst_6 = arith.constant 3.200000e+01 : f32
    %14 = vector.broadcast %cst_6 : f32 to vector<8x1xf32>
    %15 = arith.divf %13, %14 : vector<8x1xf32>
    %16 = vector.broadcast %8 : vector<8x1xf32> to vector<8x32xf32>
    %17 = arith.subf %2, %16 : vector<8x32xf32>
    %cst_7 = arith.constant 9.99999996E-13 : f32
    %18 = vector.broadcast %cst_7 : f32 to vector<8x1xf32>
    %19 = arith.addf %15, %18 : vector<8x1xf32>
    %20 = math.rsqrt %19 : vector<8x1xf32>
    %21 = vector.broadcast %20 : vector<8x1xf32> to vector<8x32xf32>
    %22 = arith.mulf %17, %21 : vector<8x32xf32>
    %23 = vector.broadcast %3 : vector<1x32xf32> to vector<8x32xf32>
    %24 = arith.mulf %22, %23 : vector<8x32xf32>
    %25 = vector.broadcast %4 : vector<1x32xf32> to vector<8x32xf32>
    %26 = arith.addf %24, %25 : vector<8x32xf32>
    %c0_8 = arith.constant 0 : index
    %c0_9 = arith.constant 0 : index
    %c0_10 = arith.constant 0 : index
    %27 = vector.load %arg2[%c0_8, %c0_9, %c0_10] : memref<1x1x8xf32, #tpu.memory_space<vmem>>, vector<1x1x8xf32>
    %28 = vector.shape_cast %27 : vector<1x1x8xf32> to vector<1x8xf32>
    %cst_11 = arith.constant 1.000000e+00 : f32
    %29 = vector.broadcast %cst_11 : f32 to vector<1x8xf32>
    %30 = arith.subf %29, %28 : vector<1x8xf32>
    %cst_12 = arith.constant -1.000000e+09 : f32
    %31 = vector.broadcast %cst_12 : f32 to vector<1x8xf32>
    %32 = arith.mulf %30, %31 : vector<1x8xf32>
    %c0_13 = arith.constant 0 : index
    %c0_14 = arith.constant 0 : index
    %c0_15 = arith.constant 0 : index
    %c0_16 = arith.constant 0 : index
    %c0_17 = arith.constant 0 : index
    %33 = vector.load %arg4[%c0_13, %c0_14, %c0_15, %c0_16, %c0_17] : memref<2x3x4x32x8xbf16, #tpu.memory_space<vmem>>, vector<1x3x4x32x8xbf16>
    %34 = vector.shape_cast %33 : vector<1x3x4x32x8xbf16> to vector<3x4x32x8xbf16>
    %c0_18 = arith.constant 0 : index
    %c0_19 = arith.constant 0 : index
    %c0_20 = arith.constant 0 : index
    %c0_21 = arith.constant 0 : index
    %c0_22 = arith.constant 0 : index
    %35 = vector.load %arg5[%c0_18, %c0_19, %c0_20, %c0_21, %c0_22] : memref<2x3x4x1x8xf32, #tpu.memory_space<vmem>>, vector<1x3x4x1x8xf32>
    %36 = vector.shape_cast %35 : vector<1x3x4x1x8xf32> to vector<3x4x1x8xf32>
    %c0_23 = arith.constant 0 : index
    %c0_24 = arith.constant 0 : index
    %c0_25 = arith.constant 0 : index
    %37 = vector.load %arg10[%c0_23, %c0_24, %c0_25] : memref<2x8x32xf32, #tpu.memory_space<vmem>>, vector<1x8x32xf32>
    %38 = vector.shape_cast %37 : vector<1x8x32xf32> to vector<8x32xf32>
    %39 = arith.truncf %26 : vector<8x32xf32> to vector<8x32xbf16>
    %40 = vector.shape_cast %39 : vector<8x32xbf16> to vector<1x8x32xbf16>
    %41 = vector.broadcast %40 : vector<1x8x32xbf16> to vector<4x8x32xbf16>
    %42 = vector.extract_strided_slice %34 {offsets = [0, 0, 0, 0], sizes = [1, 4, 32, 8], strides = [1, 1, 1, 1]} : vector<3x4x32x8xbf16> to vector<1x4x32x8xbf16>
    %43 = vector.shape_cast %42 : vector<1x4x32x8xbf16> to vector<4x32x8xbf16>
    "tpu.trace_start"() <{level = 10 : i32, message = "hsk,hkd->hsd"}> : () -> ()
    %cst_26 = arith.constant dense<0.000000e+00> : vector<4x8x8xf32>
    %44 = tpu.matmul %41, %43, %cst_26 {dimension_numbers = #tpu.dot_dimension_numbers<[2], [1], [1], [2], [0, 0, 0, 1, 1, 2], [0], [0]>} : vector<4x8x32xbf16>, vector<4x32x8xbf16>, vector<4x8x8xf32> -> vector<4x8x8xf32>
    "tpu.trace_stop"() : () -> ()
    %45 = vector.extract_strided_slice %36 {offsets = [0, 0, 0, 0], sizes = [1, 4, 1, 8], strides = [1, 1, 1, 1]} : vector<3x4x1x8xf32> to vector<1x4x1x8xf32>
    %46 = vector.shape_cast %45 : vector<1x4x1x8xf32> to vector<4x1x8xf32>
    %47 = vector.broadcast %46 : vector<4x1x8xf32> to vector<4x8x8xf32>
    %48 = arith.addf %44, %47 : vector<4x8x8xf32>
    %49 = vector.extract_strided_slice %34 {offsets = [1, 0, 0, 0], sizes = [1, 4, 32, 8], strides = [1, 1, 1, 1]} : vector<3x4x32x8xbf16> to vector<1x4x32x8xbf16>
    %50 = vector.shape_cast %49 : vector<1x4x32x8xbf16> to vector<4x32x8xbf16>
    "tpu.trace_start"() <{level = 10 : i32, message = "hsk,hkd->hsd"}> : () -> ()
    %cst_27 = arith.constant dense<0.000000e+00> : vector<4x8x8xf32>
    %51 = tpu.matmul %41, %50, %cst_27 {dimension_numbers = #tpu.dot_dimension_numbers<[2], [1], [1], [2], [0, 0, 0, 1, 1, 2], [0], [0]>} : vector<4x8x32xbf16>, vector<4x32x8xbf16>, vector<4x8x8xf32> -> vector<4x8x8xf32>
    "tpu.trace_stop"() : () -> ()
    %52 = vector.extract_strided_slice %36 {offsets = [1, 0, 0, 0], sizes = [1, 4, 1, 8], strides = [1, 1, 1, 1]} : vector<3x4x1x8xf32> to vector<1x4x1x8xf32>
    %53 = vector.shape_cast %52 : vector<1x4x1x8xf32> to vector<4x1x8xf32>
    %54 = vector.broadcast %53 : vector<4x1x8xf32> to vector<4x8x8xf32>
    %55 = arith.addf %51, %54 : vector<4x8x8xf32>
    %56 = vector.extract_strided_slice %34 {offsets = [2, 0, 0, 0], sizes = [1, 4, 32, 8], strides = [1, 1, 1, 1]} : vector<3x4x32x8xbf16> to vector<1x4x32x8xbf16>
    %57 = vector.shape_cast %56 : vector<1x4x32x8xbf16> to vector<4x32x8xbf16>
    "tpu.trace_start"() <{level = 10 : i32, message = "hsk,hkd->hsd"}> : () -> ()
    %cst_28 = arith.constant dense<0.000000e+00> : vector<4x8x8xf32>
    %58 = tpu.matmul %41, %57, %cst_28 {dimension_numbers = #tpu.dot_dimension_numbers<[2], [1], [1], [2], [0, 0, 0, 1, 1, 2], [0], [0]>} : vector<4x8x32xbf16>, vector<4x32x8xbf16>, vector<4x8x8xf32> -> vector<4x8x8xf32>
    "tpu.trace_stop"() : () -> ()
    %59 = vector.extract_strided_slice %36 {offsets = [2, 0, 0, 0], sizes = [1, 4, 1, 8], strides = [1, 1, 1, 1]} : vector<3x4x1x8xf32> to vector<1x4x1x8xf32>
    %60 = vector.shape_cast %59 : vector<1x4x1x8xf32> to vector<4x1x8xf32>
    %61 = vector.broadcast %60 : vector<4x1x8xf32> to vector<4x8x8xf32>
    %62 = arith.addf %58, %61 : vector<4x8x8xf32>
    %63 = arith.truncf %48 : vector<4x8x8xf32> to vector<4x8x8xbf16>
    %64 = arith.truncf %55 : vector<4x8x8xf32> to vector<4x8x8xbf16>
    "tpu.trace_start"() <{level = 10 : i32, message = "hqd,hkd->hqk"}> : () -> ()
    %cst_29 = arith.constant dense<0.000000e+00> : vector<4x8x8xf32>
    %65 = tpu.matmul %63, %64, %cst_29 {dimension_numbers = #tpu.dot_dimension_numbers<[2], [2], [1], [1], [0, 0, 0, 1, 1, 1], [0], [0]>} : vector<4x8x8xbf16>, vector<4x8x8xbf16>, vector<4x8x8xf32> -> vector<4x8x8xf32>
    "tpu.trace_stop"() : () -> ()
    %cst_30 = arith.constant 0.353553385 : f32
    %66 = vector.broadcast %cst_30 : f32 to vector<4x8x8xf32>
    %67 = arith.mulf %65, %66 : vector<4x8x8xf32>
    %68 = vector.shape_cast %32 : vector<1x8xf32> to vector<1x1x8xf32>
    %69 = vector.broadcast %68 : vector<1x1x8xf32> to vector<4x8x8xf32>
    %70 = arith.addf %67, %69 : vector<4x8x8xf32>
    %cst_31 = arith.constant dense<0xFF800000> : vector<4x8xf32>
    %71 = vector.multi_reduction <maximumf>, %70, %cst_31 [2] : vector<4x8x8xf32> to vector<4x8xf32>
    %72 = vector.shape_cast %71 : vector<4x8xf32> to vector<4x8x1xf32>
    %73 = vector.broadcast %72 : vector<4x8x1xf32> to vector<4x8x8xf32>
    %74 = arith.subf %70, %73 : vector<4x8x8xf32>
    %75 = math.exp %74 : vector<4x8x8xf32>
    %cst_32 = arith.constant dense<0.000000e+00> : vector<4x8xf32>
    %76 = vector.multi_reduction <add>, %75, %cst_32 [2] : vector<4x8x8xf32> to vector<4x8xf32>
    %77 = vector.shape_cast %76 : vector<4x8xf32> to vector<4x8x1xf32>
    %78 = tpu.reciprocal %77 {approx = true} : vector<4x8x1xf32> -> vector<4x8x1xf32>
    %79 = vector.broadcast %78 : vector<4x8x1xf32> to vector<4x8x8xf32>
    %80 = arith.mulf %75, %79 : vector<4x8x8xf32>
    %81 = arith.truncf %80 : vector<4x8x8xf32> to vector<4x8x8xbf16>
    %82 = arith.truncf %62 : vector<4x8x8xf32> to vector<4x8x8xbf16>
    "tpu.trace_start"() <{level = 10 : i32, message = "hqk,hkd->hqd"}> : () -> ()
    %cst_33 = arith.constant dense<0.000000e+00> : vector<4x8x8xf32>
    %83 = tpu.matmul %81, %82, %cst_33 {dimension_numbers = #tpu.dot_dimension_numbers<[2], [1], [1], [2], [0, 0, 0, 1, 1, 2], [0], [0]>} : vector<4x8x8xbf16>, vector<4x8x8xbf16>, vector<4x8x8xf32> -> vector<4x8x8xf32>
    "tpu.trace_stop"() : () -> ()
    %84 = arith.truncf %83 : vector<4x8x8xf32> to vector<4x8x8xbf16>
    %c0_34 = arith.constant 0 : index
    %c0_35 = arith.constant 0 : index
    %c0_36 = arith.constant 0 : index
    %c0_37 = arith.constant 0 : index
    %85 = vector.load %arg6[%c0_34, %c0_35, %c0_36, %c0_37] : memref<2x4x8x32xbf16, #tpu.memory_space<vmem>>, vector<1x4x8x32xbf16>
    %86 = vector.shape_cast %85 : vector<1x4x8x32xbf16> to vector<4x8x32xbf16>
    "tpu.trace_start"() <{level = 10 : i32, message = "hsd,hdk->hsk"}> : () -> ()
    %cst_38 = arith.constant dense<0.000000e+00> : vector<4x8x32xf32>
    %87 = tpu.matmul %84, %86, %cst_38 {dimension_numbers = #tpu.dot_dimension_numbers<[2], [1], [1], [2], [0, 0, 0, 1, 1, 2], [0], [0]>} : vector<4x8x8xbf16>, vector<4x8x32xbf16>, vector<4x8x32xf32> -> vector<4x8x32xf32>
    "tpu.trace_stop"() : () -> ()
    %cst_39 = arith.constant dense<0.000000e+00> : vector<8x32xf32>
    %88 = vector.multi_reduction <add>, %87, %cst_39 [0] : vector<4x8x32xf32> to vector<8x32xf32>
    %89 = vector.extract_strided_slice %38 {offsets = [0, 0], sizes = [1, 32], strides = [1, 1]} : vector<8x32xf32> to vector<1x32xf32>
    %90 = vector.broadcast %89 : vector<1x32xf32> to vector<8x32xf32>
    %91 = arith.addf %88, %90 : vector<8x32xf32>
    %92 = arith.addf %26, %91 : vector<8x32xf32>
    %93 = vector.extract_strided_slice %38 {offsets = [2, 0], sizes = [1, 32], strides = [1, 1]} : vector<8x32xf32> to vector<1x32xf32>
    %94 = vector.extract_strided_slice %38 {offsets = [3, 0], sizes = [1, 32], strides = [1, 1]} : vector<8x32xf32> to vector<1x32xf32>
    %cst_40 = arith.constant dense<0.000000e+00> : vector<8xf32>
    %95 = vector.multi_reduction <add>, %92, %cst_40 [1] : vector<8x32xf32> to vector<8xf32>
    %96 = vector.shape_cast %95 : vector<8xf32> to vector<8x1xf32>
    %cst_41 = arith.constant 3.200000e+01 : f32
    %97 = vector.broadcast %cst_41 : f32 to vector<8x1xf32>
    %98 = arith.divf %96, %97 : vector<8x1xf32>
    %99 = vector.broadcast %98 : vector<8x1xf32> to vector<8x32xf32>
    %100 = arith.subf %92, %99 : vector<8x32xf32>
    %101 = arith.mulf %100, %100 : vector<8x32xf32>
    %cst_42 = arith.constant dense<0.000000e+00> : vector<8xf32>
    %102 = vector.multi_reduction <add>, %101, %cst_42 [1] : vector<8x32xf32> to vector<8xf32>
    %103 = vector.shape_cast %102 : vector<8xf32> to vector<8x1xf32>
    %cst_43 = arith.constant 3.200000e+01 : f32
    %104 = vector.broadcast %cst_43 : f32 to vector<8x1xf32>
    %105 = arith.divf %103, %104 : vector<8x1xf32>
    %106 = vector.broadcast %98 : vector<8x1xf32> to vector<8x32xf32>
    %107 = arith.subf %92, %106 : vector<8x32xf32>
    %cst_44 = arith.constant 9.99999996E-13 : f32
    %108 = vector.broadcast %cst_44 : f32 to vector<8x1xf32>
    %109 = arith.addf %105, %108 : vector<8x1xf32>
    %110 = math.rsqrt %109 : vector<8x1xf32>
    %111 = vector.broadcast %110 : vector<8x1xf32> to vector<8x32xf32>
    %112 = arith.mulf %107, %111 : vector<8x32xf32>
    %113 = vector.broadcast %93 : vector<1x32xf32> to vector<8x32xf32>
    %114 = arith.mulf %112, %113 : vector<8x32xf32>
    %115 = vector.broadcast %94 : vector<1x32xf32> to vector<8x32xf32>
    %116 = arith.addf %114, %115 : vector<8x32xf32>
    %117 = arith.truncf %116 : vector<8x32xf32> to vector<8x32xbf16>
    %c0_45 = arith.constant 0 : index
    %c0_46 = arith.constant 0 : index
    %c0_47 = arith.constant 0 : index
    %118 = vector.load %arg7[%c0_45, %c0_46, %c0_47] : memref<2x32x64xbf16, #tpu.memory_space<vmem>>, vector<1x32x64xbf16>
    %119 = vector.shape_cast %118 : vector<1x32x64xbf16> to vector<32x64xbf16>
    %cst_48 = arith.constant dense<0.000000e+00> : vector<8x64xf32>
    %120 = tpu.matmul %117, %119, %cst_48 {dimension_numbers = #tpu.dot_dimension_numbers<[1], [0], [0], [1], [0, 0, 1, 1], [], []>} : vector<8x32xbf16>, vector<32x64xbf16>, vector<8x64xf32> -> vector<8x64xf32>
    %c0_49 = arith.constant 0 : index
    %c0_50 = arith.constant 0 : index
    %c0_51 = arith.constant 0 : index
    %121 = vector.load %arg8[%c0_49, %c0_50, %c0_51] : memref<2x1x64xf32, #tpu.memory_space<vmem>>, vector<1x1x64xf32>
    %122 = vector.shape_cast %121 : vector<1x1x64xf32> to vector<1x64xf32>
    %123 = vector.broadcast %122 : vector<1x64xf32> to vector<8x64xf32>
    %124 = arith.addf %120, %123 : vector<8x64xf32>
    %cst_52 = arith.constant 5.000000e-01 : f32
    %125 = vector.broadcast %cst_52 : f32 to vector<8x64xf32>
    %126 = arith.mulf %125, %124 : vector<8x64xf32>
    %cst_53 = arith.constant 4.471500e-02 : f32
    %127 = vector.broadcast %cst_53 : f32 to vector<8x64xf32>
    %128 = arith.mulf %127, %124 : vector<8x64xf32>
    %129 = arith.mulf %128, %124 : vector<8x64xf32>
    %130 = arith.mulf %129, %124 : vector<8x64xf32>
    %131 = arith.addf %124, %130 : vector<8x64xf32>
    %cst_54 = arith.constant 0.797884583 : f32
    %132 = vector.broadcast %cst_54 : f32 to vector<8x64xf32>
    %133 = arith.mulf %132, %131 : vector<8x64xf32>
    %134 = math.tanh %133 : vector<8x64xf32>
    %cst_55 = arith.constant 1.000000e+00 : f32
    %135 = vector.broadcast %cst_55 : f32 to vector<8x64xf32>
    %136 = arith.addf %135, %134 : vector<8x64xf32>
    %137 = arith.mulf %126, %136 : vector<8x64xf32>
    %138 = arith.truncf %137 : vector<8x64xf32> to vector<8x64xbf16>
    %c0_56 = arith.constant 0 : index
    %c0_57 = arith.constant 0 : index
    %c0_58 = arith.constant 0 : index
    %139 = vector.load %arg9[%c0_56, %c0_57, %c0_58] : memref<2x64x32xbf16, #tpu.memory_space<vmem>>, vector<1x64x32xbf16>
    %140 = vector.shape_cast %139 : vector<1x64x32xbf16> to vector<64x32xbf16>
    %cst_59 = arith.constant dense<0.000000e+00> : vector<8x32xf32>
    %141 = tpu.matmul %138, %140, %cst_59 {dimension_numbers = #tpu.dot_dimension_numbers<[1], [0], [0], [1], [0, 0, 1, 1], [], []>} : vector<8x64xbf16>, vector<64x32xbf16>, vector<8x32xf32> -> vector<8x32xf32>
    %142 = vector.extract_strided_slice %38 {offsets = [1, 0], sizes = [1, 32], strides = [1, 1]} : vector<8x32xf32> to vector<1x32xf32>
    %143 = vector.broadcast %142 : vector<1x32xf32> to vector<8x32xf32>
    %144 = arith.addf %141, %143 : vector<8x32xf32>
    %145 = arith.addf %116, %144 : vector<8x32xf32>
    %146 = vector.extract_strided_slice %38 {offsets = [4, 0], sizes = [1, 32], strides = [1, 1]} : vector<8x32xf32> to vector<1x32xf32>
    %147 = vector.extract_strided_slice %38 {offsets = [5, 0], sizes = [1, 32], strides = [1, 1]} : vector<8x32xf32> to vector<1x32xf32>
    %cst_60 = arith.constant dense<0.000000e+00> : vector<8xf32>
    %148 = vector.multi_reduction <add>, %145, %cst_60 [1] : vector<8x32xf32> to vector<8xf32>
    %149 = vector.shape_cast %148 : vector<8xf32> to vector<8x1xf32>
    %cst_61 = arith.constant 3.200000e+01 : f32
    %150 = vector.broadcast %cst_61 : f32 to vector<8x1xf32>
    %151 = arith.divf %149, %150 : vector<8x1xf32>
    %152 = vector.broadcast %151 : vector<8x1xf32> to vector<8x32xf32>
    %153 = arith.subf %145, %152 : vector<8x32xf32>
    %154 = arith.mulf %153, %153 : vector<8x32xf32>
    %cst_62 = arith.constant dense<0.000000e+00> : vector<8xf32>
    %155 = vector.multi_reduction <add>, %154, %cst_62 [1] : vector<8x32xf32> to vector<8xf32>
    %156 = vector.shape_cast %155 : vector<8xf32> to vector<8x1xf32>
    %cst_63 = arith.constant 3.200000e+01 : f32
    %157 = vector.broadcast %cst_63 : f32 to vector<8x1xf32>
    %158 = arith.divf %156, %157 : vector<8x1xf32>
    %159 = vector.broadcast %151 : vector<8x1xf32> to vector<8x32xf32>
    %160 = arith.subf %145, %159 : vector<8x32xf32>
    %cst_64 = arith.constant 9.99999996E-13 : f32
    %161 = vector.broadcast %cst_64 : f32 to vector<8x1xf32>
    %162 = arith.addf %158, %161 : vector<8x1xf32>
    %163 = math.rsqrt %162 : vector<8x1xf32>
    %164 = vector.broadcast %163 : vector<8x1xf32> to vector<8x32xf32>
    %165 = arith.mulf %160, %164 : vector<8x32xf32>
    %166 = vector.broadcast %146 : vector<1x32xf32> to vector<8x32xf32>
    %167 = arith.mulf %165, %166 : vector<8x32xf32>
    %168 = vector.broadcast %147 : vector<1x32xf32> to vector<8x32xf32>
    %169 = arith.addf %167, %168 : vector<8x32xf32>
    %c1 = arith.constant 1 : index
    %c0_65 = arith.constant 0 : index
    %c0_66 = arith.constant 0 : index
    %c0_67 = arith.constant 0 : index
    %c0_68 = arith.constant 0 : index
    %170 = vector.load %arg4[%c1, %c0_65, %c0_66, %c0_67, %c0_68] : memref<2x3x4x32x8xbf16, #tpu.memory_space<vmem>>, vector<1x3x4x32x8xbf16>
    %171 = vector.shape_cast %170 : vector<1x3x4x32x8xbf16> to vector<3x4x32x8xbf16>
    %c1_69 = arith.constant 1 : index
    %c0_70 = arith.constant 0 : index
    %c0_71 = arith.constant 0 : index
    %c0_72 = arith.constant 0 : index
    %c0_73 = arith.constant 0 : index
    %172 = vector.load %arg5[%c1_69, %c0_70, %c0_71, %c0_72, %c0_73] : memref<2x3x4x1x8xf32, #tpu.memory_space<vmem>>, vector<1x3x4x1x8xf32>
    %173 = vector.shape_cast %172 : vector<1x3x4x1x8xf32> to vector<3x4x1x8xf32>
    %c1_74 = arith.constant 1 : index
    %c0_75 = arith.constant 0 : index
    %c0_76 = arith.constant 0 : index
    %174 = vector.load %arg10[%c1_74, %c0_75, %c0_76] : memref<2x8x32xf32, #tpu.memory_space<vmem>>, vector<1x8x32xf32>
    %175 = vector.shape_cast %174 : vector<1x8x32xf32> to vector<8x32xf32>
    %176 = arith.truncf %169 : vector<8x32xf32> to vector<8x32xbf16>
    %177 = vector.shape_cast %176 : vector<8x32xbf16> to vector<1x8x32xbf16>
    %178 = vector.broadcast %177 : vector<1x8x32xbf16> to vector<4x8x32xbf16>
    %179 = vector.extract_strided_slice %171 {offsets = [0, 0, 0, 0], sizes = [1, 4, 32, 8], strides = [1, 1, 1, 1]} : vector<3x4x32x8xbf16> to vector<1x4x32x8xbf16>
    %180 = vector.shape_cast %179 : vector<1x4x32x8xbf16> to vector<4x32x8xbf16>
    "tpu.trace_start"() <{level = 10 : i32, message = "hsk,hkd->hsd"}> : () -> ()
    %cst_77 = arith.constant dense<0.000000e+00> : vector<4x8x8xf32>
    %181 = tpu.matmul %178, %180, %cst_77 {dimension_numbers = #tpu.dot_dimension_numbers<[2], [1], [1], [2], [0, 0, 0, 1, 1, 2], [0], [0]>} : vector<4x8x32xbf16>, vector<4x32x8xbf16>, vector<4x8x8xf32> -> vector<4x8x8xf32>
    "tpu.trace_stop"() : () -> ()
    %182 = vector.extract_strided_slice %173 {offsets = [0, 0, 0, 0], sizes = [1, 4, 1, 8], strides = [1, 1, 1, 1]} : vector<3x4x1x8xf32> to vector<1x4x1x8xf32>
    %183 = vector.shape_cast %182 : vector<1x4x1x8xf32> to vector<4x1x8xf32>
    %184 = vector.broadcast %183 : vector<4x1x8xf32> to vector<4x8x8xf32>
    %185 = arith.addf %181, %184 : vector<4x8x8xf32>
    %186 = vector.extract_strided_slice %171 {offsets = [1, 0, 0, 0], sizes = [1, 4, 32, 8], strides = [1, 1, 1, 1]} : vector<3x4x32x8xbf16> to vector<1x4x32x8xbf16>
    %187 = vector.shape_cast %186 : vector<1x4x32x8xbf16> to vector<4x32x8xbf16>
    "tpu.trace_start"() <{level = 10 : i32, message = "hsk,hkd->hsd"}> : () -> ()
    %cst_78 = arith.constant dense<0.000000e+00> : vector<4x8x8xf32>
    %188 = tpu.matmul %178, %187, %cst_78 {dimension_numbers = #tpu.dot_dimension_numbers<[2], [1], [1], [2], [0, 0, 0, 1, 1, 2], [0], [0]>} : vector<4x8x32xbf16>, vector<4x32x8xbf16>, vector<4x8x8xf32> -> vector<4x8x8xf32>
    "tpu.trace_stop"() : () -> ()
    %189 = vector.extract_strided_slice %173 {offsets = [1, 0, 0, 0], sizes = [1, 4, 1, 8], strides = [1, 1, 1, 1]} : vector<3x4x1x8xf32> to vector<1x4x1x8xf32>
    %190 = vector.shape_cast %189 : vector<1x4x1x8xf32> to vector<4x1x8xf32>
    %191 = vector.broadcast %190 : vector<4x1x8xf32> to vector<4x8x8xf32>
    %192 = arith.addf %188, %191 : vector<4x8x8xf32>
    %193 = vector.extract_strided_slice %171 {offsets = [2, 0, 0, 0], sizes = [1, 4, 32, 8], strides = [1, 1, 1, 1]} : vector<3x4x32x8xbf16> to vector<1x4x32x8xbf16>
    %194 = vector.shape_cast %193 : vector<1x4x32x8xbf16> to vector<4x32x8xbf16>
    "tpu.trace_start"() <{level = 10 : i32, message = "hsk,hkd->hsd"}> : () -> ()
    %cst_79 = arith.constant dense<0.000000e+00> : vector<4x8x8xf32>
    %195 = tpu.matmul %178, %194, %cst_79 {dimension_numbers = #tpu.dot_dimension_numbers<[2], [1], [1], [2], [0, 0, 0, 1, 1, 2], [0], [0]>} : vector<4x8x32xbf16>, vector<4x32x8xbf16>, vector<4x8x8xf32> -> vector<4x8x8xf32>
    "tpu.trace_stop"() : () -> ()
    %196 = vector.extract_strided_slice %173 {offsets = [2, 0, 0, 0], sizes = [1, 4, 1, 8], strides = [1, 1, 1, 1]} : vector<3x4x1x8xf32> to vector<1x4x1x8xf32>
    %197 = vector.shape_cast %196 : vector<1x4x1x8xf32> to vector<4x1x8xf32>
    %198 = vector.broadcast %197 : vector<4x1x8xf32> to vector<4x8x8xf32>
    %199 = arith.addf %195, %198 : vector<4x8x8xf32>
    %200 = arith.truncf %185 : vector<4x8x8xf32> to vector<4x8x8xbf16>
    %201 = arith.truncf %192 : vector<4x8x8xf32> to vector<4x8x8xbf16>
    "tpu.trace_start"() <{level = 10 : i32, message = "hqd,hkd->hqk"}> : () -> ()
    %cst_80 = arith.constant dense<0.000000e+00> : vector<4x8x8xf32>
    %202 = tpu.matmul %200, %201, %cst_80 {dimension_numbers = #tpu.dot_dimension_numbers<[2], [2], [1], [1], [0, 0, 0, 1, 1, 1], [0], [0]>} : vector<4x8x8xbf16>, vector<4x8x8xbf16>, vector<4x8x8xf32> -> vector<4x8x8xf32>
    "tpu.trace_stop"() : () -> ()
    %cst_81 = arith.constant 0.353553385 : f32
    %203 = vector.broadcast %cst_81 : f32 to vector<4x8x8xf32>
    %204 = arith.mulf %202, %203 : vector<4x8x8xf32>
    %205 = vector.shape_cast %32 : vector<1x8xf32> to vector<1x1x8xf32>
    %206 = vector.broadcast %205 : vector<1x1x8xf32> to vector<4x8x8xf32>
    %207 = arith.addf %204, %206 : vector<4x8x8xf32>
    %cst_82 = arith.constant dense<0xFF800000> : vector<4x8xf32>
    %208 = vector.multi_reduction <maximumf>, %207, %cst_82 [2] : vector<4x8x8xf32> to vector<4x8xf32>
    %209 = vector.shape_cast %208 : vector<4x8xf32> to vector<4x8x1xf32>
    %210 = vector.broadcast %209 : vector<4x8x1xf32> to vector<4x8x8xf32>
    %211 = arith.subf %207, %210 : vector<4x8x8xf32>
    %212 = math.exp %211 : vector<4x8x8xf32>
    %cst_83 = arith.constant dense<0.000000e+00> : vector<4x8xf32>
    %213 = vector.multi_reduction <add>, %212, %cst_83 [2] : vector<4x8x8xf32> to vector<4x8xf32>
    %214 = vector.shape_cast %213 : vector<4x8xf32> to vector<4x8x1xf32>
    %215 = tpu.reciprocal %214 {approx = true} : vector<4x8x1xf32> -> vector<4x8x1xf32>
    %216 = vector.broadcast %215 : vector<4x8x1xf32> to vector<4x8x8xf32>
    %217 = arith.mulf %212, %216 : vector<4x8x8xf32>
    %218 = arith.truncf %217 : vector<4x8x8xf32> to vector<4x8x8xbf16>
    %219 = arith.truncf %199 : vector<4x8x8xf32> to vector<4x8x8xbf16>
    "tpu.trace_start"() <{level = 10 : i32, message = "hqk,hkd->hqd"}> : () -> ()
    %cst_84 = arith.constant dense<0.000000e+00> : vector<4x8x8xf32>
    %220 = tpu.matmul %218, %219, %cst_84 {dimension_numbers = #tpu.dot_dimension_numbers<[2], [1], [1], [2], [0, 0, 0, 1, 1, 2], [0], [0]>} : vector<4x8x8xbf16>, vector<4x8x8xbf16>, vector<4x8x8xf32> -> vector<4x8x8xf32>
    "tpu.trace_stop"() : () -> ()
    %221 = arith.truncf %220 : vector<4x8x8xf32> to vector<4x8x8xbf16>
    %c1_85 = arith.constant 1 : index
    %c0_86 = arith.constant 0 : index
    %c0_87 = arith.constant 0 : index
    %c0_88 = arith.constant 0 : index
    %222 = vector.load %arg6[%c1_85, %c0_86, %c0_87, %c0_88] : memref<2x4x8x32xbf16, #tpu.memory_space<vmem>>, vector<1x4x8x32xbf16>
    %223 = vector.shape_cast %222 : vector<1x4x8x32xbf16> to vector<4x8x32xbf16>
    "tpu.trace_start"() <{level = 10 : i32, message = "hsd,hdk->hsk"}> : () -> ()
    %cst_89 = arith.constant dense<0.000000e+00> : vector<4x8x32xf32>
    %224 = tpu.matmul %221, %223, %cst_89 {dimension_numbers = #tpu.dot_dimension_numbers<[2], [1], [1], [2], [0, 0, 0, 1, 1, 2], [0], [0]>} : vector<4x8x8xbf16>, vector<4x8x32xbf16>, vector<4x8x32xf32> -> vector<4x8x32xf32>
    "tpu.trace_stop"() : () -> ()
    %cst_90 = arith.constant dense<0.000000e+00> : vector<8x32xf32>
    %225 = vector.multi_reduction <add>, %224, %cst_90 [0] : vector<4x8x32xf32> to vector<8x32xf32>
    %226 = vector.extract_strided_slice %175 {offsets = [0, 0], sizes = [1, 32], strides = [1, 1]} : vector<8x32xf32> to vector<1x32xf32>
    %227 = vector.broadcast %226 : vector<1x32xf32> to vector<8x32xf32>
    %228 = arith.addf %225, %227 : vector<8x32xf32>
    %229 = arith.addf %169, %228 : vector<8x32xf32>
    %230 = vector.extract_strided_slice %175 {offsets = [2, 0], sizes = [1, 32], strides = [1, 1]} : vector<8x32xf32> to vector<1x32xf32>
    %231 = vector.extract_strided_slice %175 {offsets = [3, 0], sizes = [1, 32], strides = [1, 1]} : vector<8x32xf32> to vector<1x32xf32>
    %cst_91 = arith.constant dense<0.000000e+00> : vector<8xf32>
    %232 = vector.multi_reduction <add>, %229, %cst_91 [1] : vector<8x32xf32> to vector<8xf32>
    %233 = vector.shape_cast %232 : vector<8xf32> to vector<8x1xf32>
    %cst_92 = arith.constant 3.200000e+01 : f32
    %234 = vector.broadcast %cst_92 : f32 to vector<8x1xf32>
    %235 = arith.divf %233, %234 : vector<8x1xf32>
    %236 = vector.broadcast %235 : vector<8x1xf32> to vector<8x32xf32>
    %237 = arith.subf %229, %236 : vector<8x32xf32>
    %238 = arith.mulf %237, %237 : vector<8x32xf32>
    %cst_93 = arith.constant dense<0.000000e+00> : vector<8xf32>
    %239 = vector.multi_reduction <add>, %238, %cst_93 [1] : vector<8x32xf32> to vector<8xf32>
    %240 = vector.shape_cast %239 : vector<8xf32> to vector<8x1xf32>
    %cst_94 = arith.constant 3.200000e+01 : f32
    %241 = vector.broadcast %cst_94 : f32 to vector<8x1xf32>
    %242 = arith.divf %240, %241 : vector<8x1xf32>
    %243 = vector.broadcast %235 : vector<8x1xf32> to vector<8x32xf32>
    %244 = arith.subf %229, %243 : vector<8x32xf32>
    %cst_95 = arith.constant 9.99999996E-13 : f32
    %245 = vector.broadcast %cst_95 : f32 to vector<8x1xf32>
    %246 = arith.addf %242, %245 : vector<8x1xf32>
    %247 = math.rsqrt %246 : vector<8x1xf32>
    %248 = vector.broadcast %247 : vector<8x1xf32> to vector<8x32xf32>
    %249 = arith.mulf %244, %248 : vector<8x32xf32>
    %250 = vector.broadcast %230 : vector<1x32xf32> to vector<8x32xf32>
    %251 = arith.mulf %249, %250 : vector<8x32xf32>
    %252 = vector.broadcast %231 : vector<1x32xf32> to vector<8x32xf32>
    %253 = arith.addf %251, %252 : vector<8x32xf32>
    %254 = arith.truncf %253 : vector<8x32xf32> to vector<8x32xbf16>
    %c1_96 = arith.constant 1 : index
    %c0_97 = arith.constant 0 : index
    %c0_98 = arith.constant 0 : index
    %255 = vector.load %arg7[%c1_96, %c0_97, %c0_98] : memref<2x32x64xbf16, #tpu.memory_space<vmem>>, vector<1x32x64xbf16>
    %256 = vector.shape_cast %255 : vector<1x32x64xbf16> to vector<32x64xbf16>
    %cst_99 = arith.constant dense<0.000000e+00> : vector<8x64xf32>
    %257 = tpu.matmul %254, %256, %cst_99 {dimension_numbers = #tpu.dot_dimension_numbers<[1], [0], [0], [1], [0, 0, 1, 1], [], []>} : vector<8x32xbf16>, vector<32x64xbf16>, vector<8x64xf32> -> vector<8x64xf32>
    %c1_100 = arith.constant 1 : index
    %c0_101 = arith.constant 0 : index
    %c0_102 = arith.constant 0 : index
    %258 = vector.load %arg8[%c1_100, %c0_101, %c0_102] : memref<2x1x64xf32, #tpu.memory_space<vmem>>, vector<1x1x64xf32>
    %259 = vector.shape_cast %258 : vector<1x1x64xf32> to vector<1x64xf32>
    %260 = vector.broadcast %259 : vector<1x64xf32> to vector<8x64xf32>
    %261 = arith.addf %257, %260 : vector<8x64xf32>
    %cst_103 = arith.constant 5.000000e-01 : f32
    %262 = vector.broadcast %cst_103 : f32 to vector<8x64xf32>
    %263 = arith.mulf %262, %261 : vector<8x64xf32>
    %cst_104 = arith.constant 4.471500e-02 : f32
    %264 = vector.broadcast %cst_104 : f32 to vector<8x64xf32>
    %265 = arith.mulf %264, %261 : vector<8x64xf32>
    %266 = arith.mulf %265, %261 : vector<8x64xf32>
    %267 = arith.mulf %266, %261 : vector<8x64xf32>
    %268 = arith.addf %261, %267 : vector<8x64xf32>
    %cst_105 = arith.constant 0.797884583 : f32
    %269 = vector.broadcast %cst_105 : f32 to vector<8x64xf32>
    %270 = arith.mulf %269, %268 : vector<8x64xf32>
    %271 = math.tanh %270 : vector<8x64xf32>
    %cst_106 = arith.constant 1.000000e+00 : f32
    %272 = vector.broadcast %cst_106 : f32 to vector<8x64xf32>
    %273 = arith.addf %272, %271 : vector<8x64xf32>
    %274 = arith.mulf %263, %273 : vector<8x64xf32>
    %275 = arith.truncf %274 : vector<8x64xf32> to vector<8x64xbf16>
    %c1_107 = arith.constant 1 : index
    %c0_108 = arith.constant 0 : index
    %c0_109 = arith.constant 0 : index
    %276 = vector.load %arg9[%c1_107, %c0_108, %c0_109] : memref<2x64x32xbf16, #tpu.memory_space<vmem>>, vector<1x64x32xbf16>
    %277 = vector.shape_cast %276 : vector<1x64x32xbf16> to vector<64x32xbf16>
    %cst_110 = arith.constant dense<0.000000e+00> : vector<8x32xf32>
    %278 = tpu.matmul %275, %277, %cst_110 {dimension_numbers = #tpu.dot_dimension_numbers<[1], [0], [0], [1], [0, 0, 1, 1], [], []>} : vector<8x64xbf16>, vector<64x32xbf16>, vector<8x32xf32> -> vector<8x32xf32>
    %279 = vector.extract_strided_slice %175 {offsets = [1, 0], sizes = [1, 32], strides = [1, 1]} : vector<8x32xf32> to vector<1x32xf32>
    %280 = vector.broadcast %279 : vector<1x32xf32> to vector<8x32xf32>
    %281 = arith.addf %278, %280 : vector<8x32xf32>
    %282 = arith.addf %253, %281 : vector<8x32xf32>
    %283 = vector.extract_strided_slice %175 {offsets = [4, 0], sizes = [1, 32], strides = [1, 1]} : vector<8x32xf32> to vector<1x32xf32>
    %284 = vector.extract_strided_slice %175 {offsets = [5, 0], sizes = [1, 32], strides = [1, 1]} : vector<8x32xf32> to vector<1x32xf32>
    %cst_111 = arith.constant dense<0.000000e+00> : vector<8xf32>
    %285 = vector.multi_reduction <add>, %282, %cst_111 [1] : vector<8x32xf32> to vector<8xf32>
    %286 = vector.shape_cast %285 : vector<8xf32> to vector<8x1xf32>
    %cst_112 = arith.constant 3.200000e+01 : f32
    %287 = vector.broadcast %cst_112 : f32 to vector<8x1xf32>
    %288 = arith.divf %286, %287 : vector<8x1xf32>
    %289 = vector.broadcast %288 : vector<8x1xf32> to vector<8x32xf32>
    %290 = arith.subf %282, %289 : vector<8x32xf32>
    %291 = arith.mulf %290, %290 : vector<8x32xf32>
    %cst_113 = arith.constant dense<0.000000e+00> : vector<8xf32>
    %292 = vector.multi_reduction <add>, %291, %cst_113 [1] : vector<8x32xf32> to vector<8xf32>
    %293 = vector.shape_cast %292 : vector<8xf32> to vector<8x1xf32>
    %cst_114 = arith.constant 3.200000e+01 : f32
    %294 = vector.broadcast %cst_114 : f32 to vector<8x1xf32>
    %295 = arith.divf %293, %294 : vector<8x1xf32>
    %296 = vector.broadcast %288 : vector<8x1xf32> to vector<8x32xf32>
    %297 = arith.subf %282, %296 : vector<8x32xf32>
    %cst_115 = arith.constant 9.99999996E-13 : f32
    %298 = vector.broadcast %cst_115 : f32 to vector<8x1xf32>
    %299 = arith.addf %295, %298 : vector<8x1xf32>
    %300 = math.rsqrt %299 : vector<8x1xf32>
    %301 = vector.broadcast %300 : vector<8x1xf32> to vector<8x32xf32>
    %302 = arith.mulf %297, %301 : vector<8x32xf32>
    %303 = vector.broadcast %283 : vector<1x32xf32> to vector<8x32xf32>
    %304 = arith.mulf %302, %303 : vector<8x32xf32>
    %305 = vector.broadcast %284 : vector<1x32xf32> to vector<8x32xf32>
    %306 = arith.addf %304, %305 : vector<8x32xf32>
    %c0_116 = arith.constant 0 : index
    %c0_117 = arith.constant 0 : index
    %c0_118 = arith.constant 0 : index
    %307 = vector.load %arg11[%c0_116, %c0_117, %c0_118] : memref<1x8x32xf32, #tpu.memory_space<vmem>>, vector<1x8x32xf32>
    %308 = vector.shape_cast %307 : vector<1x8x32xf32> to vector<8x32xf32>
    %309 = vector.shape_cast %306 : vector<8x32xf32> to vector<1x8x32xf32>
    tpu.vector_store %arg11[%c0_116, %c0_117, %c0_118], %309 {strides = array<i32>} : memref<1x8x32xf32, #tpu.memory_space<vmem>>, vector<1x8x32xf32>,
    return
  }
  func.func @transform_0(%arg0: i32) -> (i32, i32, i32) {
    %c0_i32 = arith.constant 0 : i32
    %c0_i32_0 = arith.constant 0 : i32
    %c0_i32_1 = arith.constant 0 : i32
    return %arg0, %c0_i32, %c0_i32_0 : i32, i32, i32
  }
  func.func @transform_1(%arg0: i32) -> (i32, i32, i32) {
    %c0_i32 = arith.constant 0 : i32
    %c0_i32_0 = arith.constant 0 : i32
    %c0_i32_1 = arith.constant 0 : i32
    return %arg0, %c0_i32, %c0_i32_0 : i32, i32, i32
  }
  func.func @transform_2(%arg0: i32) -> (i32, i32) {
    %c0_i32 = arith.constant 0 : i32
    %c0_i32_0 = arith.constant 0 : i32
    %c0_i32_1 = arith.constant 0 : i32
    return %c0_i32, %c0_i32_0 : i32, i32
  }
  func.func @transform_3(%arg0: i32) -> (i32, i32, i32, i32, i32) {
    %c0_i32 = arith.constant 0 : i32
    %c0_i32_0 = arith.constant 0 : i32
    %c0_i32_1 = arith.constant 0 : i32
    %c0_i32_2 = arith.constant 0 : i32
    %c0_i32_3 = arith.constant 0 : i32
    %c0_i32_4 = arith.constant 0 : i32
    return %c0_i32, %c0_i32_0, %c0_i32_1, %c0_i32_2, %c0_i32_3 : i32, i32, i32, i32, i32
  }
  func.func @transform_4(%arg0: i32) -> (i32, i32, i32, i32, i32) {
    %c0_i32 = arith.constant 0 : i32
    %c0_i32_0 = arith.constant 0 : i32
    %c0_i32_1 = arith.constant 0 : i32
    %c0_i32_2 = arith.constant 0 : i32
    %c0_i32_3 = arith.constant 0 : i32
    %c0_i32_4 = arith.constant 0 : i32
    return %c0_i32, %c0_i32_0, %c0_i32_1, %c0_i32_2, %c0_i32_3 : i32, i32, i32, i32, i32
  }
  func.func @transform_5(%arg0: i32) -> (i32, i32, i32, i32) {
    %c0_i32 = arith.constant 0 : i32
    %c0_i32_0 = arith.constant 0 : i32
    %c0_i32_1 = arith.constant 0 : i32
    %c0_i32_2 = arith.constant 0 : i32
    %c0_i32_3 = arith.constant 0 : i32
    return %c0_i32, %c0_i32_0, %c0_i32_1, %c0_i32_2 : i32, i32, i32, i32
  }
  func.func @transform_6(%arg0: i32) -> (i32, i32, i32) {
    %c0_i32 = arith.constant 0 : i32
    %c0_i32_0 = arith.constant 0 : i32
    %c0_i32_1 = arith.constant 0 : i32
    %c0_i32_2 = arith.constant 0 : i32
    return %c0_i32, %c0_i32_0, %c0_i32_1 : i32, i32, i32
  }
  func.func @transform_7(%arg0: i32) -> (i32, i32, i32) {
    %c0_i32 = arith.constant 0 : i32
    %c0_i32_0 = arith.constant 0 : i32
    %c0_i32_1 = arith.constant 0 : i32
    %c0_i32_2 = arith.constant 0 : i32
    return %c0_i32, %c0_i32_0, %c0_i32_1 : i32, i32, i32
  }
  func.func @transform_8(%arg0: i32) -> (i32, i32, i32) {
    %c0_i32 = arith.constant 0 : i32
    %c0_i32_0 = arith.constant 0 : i32
    %c0_i32_1 = arith.constant 0 : i32
    %c0_i32_2 = arith.constant 0 : i32
    return %c0_i32, %c0_i32_0, %c0_i32_1 : i32, i32, i32
  }
  func.func @transform_9(%arg0: i32) -> (i32, i32, i32) {
    %c0_i32 = arith.constant 0 : i32
    %c0_i32_0 = arith.constant 0 : i32
    %c0_i32_1 = arith.constant 0 : i32
    %c0_i32_2 = arith.constant 0 : i32
    return %c0_i32, %c0_i32_0, %c0_i32_1 : i32, i32, i32
  }
  func.func @transform_10(%arg0: i32) -> (i32, i32, i32) {
    %c0_i32 = arith.constant 0 : i32
    %c0_i32_0 = arith.constant 0 : i32
    %c0_i32_1 = arith.constant 0 : i32
    return %arg0, %c0_i32, %c0_i32_0 : i32, i32, i32
  }
}

</mosaic_0001>

<bundles_post_ra>
// kernel: tpu_custom_call.1
= control target key start
LH: loop header
LB: loop body
LE: loop exit
PB: predicated region body
PF: predicated region fallthrough
CT: control target
= control target key end

     0   :  { %15 = vsyncpa [#allocation3], 0  ;;  %s3451_s0 = inlined_call_operand.vmem [shape: f32[2,8,32], index: 0, kind: input, shape index: {}]   ;;  %s3452_s1 = inlined_call_operand.vmem [shape: f32[2,1,8], index: 1, kind: input, shape index: {}]   ;;  %s3453_s2 = inlined_call_operand.vmem [shape: f32[2,32], index: 2, kind: input, shape index: {}]   ;;  %s3454_s3 = inlined_call_operand.vmem [shape: bf16[2,3,4,32,8], index: 3, kind: input, shape index: {}]   ;;  %s3455_s4 = inlined_call_operand.vmem [shape: f32[2,3,4,1,8], index: 4, kind: input, shape index: {}]   ;;  %s3456_s5 = inlined_call_operand.vmem [shape: bf16[2,4,8,32], index: 5, kind: input, shape index: {}]   ;;  %s3457_s6 = inlined_call_operand.vmem [shape: bf16[2,32,64], index: 6, kind: input, shape index: {}]   ;;  %s3458_s7 = inlined_call_operand.vmem [shape: f32[2,1,64], index: 7, kind: input, shape index: {}]   ;;  %s3459_s8 = inlined_call_operand.vmem [shape: bf16[2,64,32], index: 8, kind: input, shape index: {}]   ;;  %s3460_s9 = inlined_call_operand.vmem [shape: f32[2,8,32], index: 9, kind: input, shape index: {}]   ;;  %s3461_s10 = inlined_call_operand.hbm [shape: f32[2,8,32], index: 10, kind: output, shape index: {}]  }
   0x1   :  { %17 = vsyncpa [#allocation3 + $0x1], 0  ;;  %s2909_s13 = smov 0   ;;  %s2911_s14 = smov 0  }
   0x2   :  { %s2913_s15 = smov 0   ;;  %s2915_s16 = smov 0  }
   0x3 LB: > { %s2930_s17 = sadd.s32 4294967295, %s2851_s16   ;;  %s2235_s18 = sadd.s32 4294967294, %s2851_s16   ;;  %s2851_s16 = sphi %s2915_s16, %s3467_s16   ;;  %s2847_s15 = sphi %s2913_s15, %s3466_s15   ;;  %s2843_s14 = sphi %s2911_s14, %s3465_s14   ;;  %s2839_s13 = sphi %s2909_s13, %s3464_s13  }
   0x4   : > { %s2934_s19 = sadd.s32 1, %s2851_s16   ;;  %s250_s20 = sadd.s32 1, %s2847_s15 }
   0x5   : > { %s247_s21 = ssub.s32 %s2851_s16, %s2934_s19  ;;  %p260_p0 = scmp.ne.s32.totalorder %s2847_s15, %s2843_s14 }
   0x6   : > { %p248_p1 = scmp.eq.s32.totalorder %s247_s21, 0  ;;  %p261_p2 = scmp.eq.s32.totalorder %s2930_s17, 1 }
   0x7   : > { %p266_p3 = scmp.ne.s32.totalorder %s2843_s14, %s2839_s13  ;;  %p267_p4 = scmp.eq.s32.totalorder %s2235_s18, 1 }
   0x8   : > { %s2945_s22 = scalar_select %p248_p1, %s2847_s15, %s250_s20  }
   0x9   : > { %p2947_p5 = por %p261_p2, %p260_p0  ;;  %p2951_p6 = por %p267_p4, %p266_p3 }
   0xa   : > { %p2238_p7 = scmp.ge.s32.totalorder %s2851_s16, 1  ;;  %p322_p8 = scmp.lt.s32.totalorder %s2851_s16, 3 }
   0xc   : > { %p323_p9 = pnand %p2238_p7, %p322_p8 }
   0xd   : > { %p362_p10 = scmp.lt.s32.totalorder (!%p323_p9), %s2930_s17, 1  ;;  %s2612_s27 = sshll.u32 (!%p323_p9), %s2930_s17, 3 }
   0xe   : > { %326 = sbr.rel (%p323_p9) target bundleno = 3613 (0xe1d), region = 60  ;;  %s2162_s30 = scalar_lea.hbm (!%p323_p9), %s3461_s10, %s2612_s27 }
   0xf   : > { %s2166_s18 = sshll.u32 (!%p323_p9), %s2162_s30, 4  ;;  %s2167_s18 = int_to_ptr.hbm [resolvable:$true] %s2166_s18 }
  0x10   : > { %s2803_s20 = sshra.s32 (!%p323_p9), %s2167_s18, 4  ;;  %s2804_s20 = int_to_ptr.hbm [resolvable:$true] %s2803_s20 }
  0x11   : > { %s2805_s21 = scalar_lea.hbm (!%p323_p9), %s2804_s20, 8  ;;  %p2810_p0 = scmp.lt.s32.totalorder (!%p323_p9), %s2804_s20, %s3461_s10 }
  0x12   : > { %p2806_p11 = scmp.ne.s32.totalorder (!%p323_p9), %s2804_s20, %s2805_s21 }
  0x13   : > { %s2959_s25 = scalar_select %p362_p10, %s2930_s17, 1  ;;  %vm372_vm0 = vcmask 261120   ;;  %v2853_v2 = vmov 32.0   ;;  %v2616_v14 = vld [vmem:[%s3454_s3 + $0x8] sm:$0xff]  ;;  %v2618_v15 = vld [vmem:[%s3454_s3 + $0x18] sm:$0xff]  ;;  %v2615_v18 = vld [vmem:[%s3454_s3] sm:$0xff] }
  0x14   : > { %2741 = vrcp.f32 %v2853_v2  ;;  %v2620_v16 = vld [vmem:[%s3454_s3 + $0x28] sm:$0xff]  ;;  %v2622_v17 = vld [vmem:[%s3454_s3 + $0x38] sm:$0xff]  ;;  %504 = vmatpush.bf16.msra.mxu0 %v2616_v14  ;;  %529 = vmatpush.bf16.msra.mxu1 %v2618_v15  ;;  %v2617_v19 = vld [vmem:[%s3454_s3 + $0x10] sm:$0xff]  ;;  %vm818_vm5 = vcmask 64512   ;;  %vm961_vm6 = vcmask 1043456   ;;  %vm1235_vm10 = vcmask 523264   ;;  %p2807_p12 = pnand %p2806_p11, %p2947_p5 }
  0x15   : > { %s2240_s26 = sshll.u32 %s2959_s25, 3  ;;  %554 = vmatpush.bf16.msra.mxu2 %v2620_v16  ;;  %579 = vmatpush.bf16.msra.mxu3 %v2622_v17  ;;  %v2619_v20 = vld [vmem:[%s3454_s3 + $0x20] sm:$0xff]  ;;  %v2621_v21 = vld [vmem:[%s3454_s3 + $0x30] sm:$0xff]  ;;  %v2624_v23 = vld [vmem:[%s3454_s3 + $0x48] sm:$0xff] }
  0x16   : > { %s365_s29 = scalar_lea.vmem %s3451_s0, %s2240_s26  ;;  %v2626_v24 = vld [vmem:[%s3454_s3 + $0x58] sm:$0xff]  ;;  %v2628_v25 = vld [vmem:[%s3454_s3 + $0x68] sm:$0xff]  ;;  %v2623_v28 = vld [vmem:[%s3454_s3 + $0x40] sm:$0xff]  ;;  %s368_s26 = scalar_lea.vmem %s3452_s1, %s2959_s25 }
  0x17   : > { %v371_v0 = vld [vmem:[%s365_s29] sm:$0xff]  ;;  %v2630_v27 = vld [vmem:[%s3454_s3 + $0x78] sm:$0xff]  ;;  %v2625_v29 = vld [vmem:[%s3454_s3 + $0x50] sm:$0xff]  ;;  %p2808_p13 = pneg %p2807_p12 }
  0x18   : > { %v373_v1 = vsel %vm372_vm0, %v371_v0, 0.0  ;;  %505 = vmatpush.bf16.msra.mxu0 %v2615_v18  ;;  %530 = vmatpush.bf16.msra.mxu1 %v2617_v19  ;;  %v2627_v31 = vld [vmem:[%s3454_s3 + $0x60] sm:$0xff]  ;;  %v2629_v32 = vld [vmem:[%s3454_s3 + $0x70] sm:$0xff]  ;;  %v2632_v47 = vld [vmem:[%s3454_s3 + $0x88] sm:$0xff] }
  0x19   : > { %374 = vadd.xlane.f32.xlu0 %v373_v1  ;;  %555 = vmatpush.bf16.msra.mxu2 %v2619_v20  ;;  %v370_v37 = vld [vmem:[%s3453_s2] sm:$0x3]  ;;  %v2634_v48 = vld [vmem:[%s3454_s3 + $0x98] sm:$0xff]  ;;  %v2636_v49 = vld [vmem:[%s3454_s3 + $0xa8] sm:$0xff] }
  0x1a   : > { %v2742_v3 = vpop.eup %2741  ;;  %580 = vmatpush.bf16.msra.mxu3 %v2621_v21  ;;  %v402_v40 = vperm.slane %v370_v37, 0  ;;  %v404_v42 = vperm.slane %v370_v37, 1  ;;  %v2638_v50 = vld [vmem:[%s3454_s3 + $0xb8] sm:$0xff]  ;;  %v2631_v51 = vld [vmem:[%s3454_s3 + $0x80] sm:$0xff]  ;;  %v2633_v52 = vld [vmem:[%s3454_s3 + $0x90] sm:$0xff] }
  0x1b   : > { %v377_v4 = vmul.f32 32.0, %v2742_v3  ;;  %vm381_vm1 = vweird.f32 %v2742_v3  ;;  %v2635_v53 = vld [vmem:[%s3454_s3 + $0xa0] sm:$0xff]  ;;  %v2637_v54 = vld [vmem:[%s3454_s3 + $0xb0] sm:$0xff] }
  0x1c   : > { %616 = vmatpush.bf16.msrb.mxu0 %v2624_v23  ;;  %641 = vmatpush.bf16.msrb.mxu1 %v2626_v24  ;;  %v2719_v61 = vld [vmem:[%s3455_s4 + $0x4] ss:$0 sm:$0xff]  ;;  %v2720_v62 = vld [vmem:[%s3455_s4 + $0x5] ss:$0 sm:$0xff]  ;;  %v2718_v23 = vld [vmem:[%s3455_s4 + $0x3] ss:$0 sm:$0xff] }
  0x1d   : > { %v378_v5 = vsub.f32 1.0, %v377_v4  ;;  %666 = vmatpush.bf16.msrb.mxu2 %v2628_v25 }
  0x1e   : > { %691 = vmatpush.bf16.msrb.mxu3 %v2630_v27 }
  0x1f   : > { %v379_v6 = vmul.f32 %v2742_v3, %v378_v5  ;;  %v2715_v5 = vld [vmem:[%s3455_s4] ss:$0 sm:$0xff] }
  0x20   : > { %617 = vmatpush.bf16.msrb.mxu0 %v2623_v28  ;;  %642 = vmatpush.bf16.msrb.mxu1 %v2625_v29 }
  0x21   : > { %v380_v7 = vadd.f32 %v2742_v3, %v379_v6  ;;  %667 = vmatpush.bf16.msrb.mxu2 %v2627_v31  ;;  %v2724_v31 = vld [vmem:[%s3455_s4 + $0x9] ss:$0 sm:$0xff] }
  0x22   : > { %692 = vmatpush.bf16.msrb.mxu3 %v2629_v32 }
  0x23   : > { %v2966_v8 = vsel %vm381_vm1, %v2742_v3, %v380_v7 }
  0x8c   : > { %v375_v9 = vpop.xlane.xlu0 %374 }
  0x8d   : > { %v383_v10 = vmul.f32 %v2966_v8, %v375_v9  ;;  %v2716_v9 = vld [vmem:[%s3455_s4 + $0x1] ss:$0 sm:$0xff] }
  0x8f   : > { %v384_v11 = vsub.f32 %v371_v0, %v383_v10  ;;  %v2721_v10 = vld [vmem:[%s3455_s4 + $0x6] ss:$0 sm:$0xff] }
  0x91   : > { %v385_v12 = vmul.f32 %v384_v11, %v384_v11 }
  0x93   : > { %v386_v13 = vsel %vm372_vm0, %v385_v12, 0.0 }
  0x94   : > { %387 = vadd.xlane.f32.xlu0 %v386_v13 }
 0x107   : > { %v388_v22 = vpop.xlane.xlu0 %387 }
 0x108   : > { %v389_v26 = vmul.f32 %v388_v22, %v2966_v8  ;;  %v2717_v22 = vld [vmem:[%s3455_s4 + $0x2] ss:$0 sm:$0xff] }
 0x10a   : > { %v390_v30 = vadd.f32 1e-12, %v389_v26 }
 0x10c   : > { %2743 = vrsqrt.f32 %v390_v30  ;;  %vm397_vm3 = vweird.f32 %v390_v30 }
 0x112   : > { %v2744_v33 = vpop.eup %2743 }
 0x113   : > { %v392_v34 = vmul.f32 %v2744_v33, %v390_v30  ;;  %vm398_vm2 = vweird.f32 %v2744_v33  ;;  %v2723_v30 = vld [vmem:[%s3455_s4 + $0x8] ss:$0 sm:$0xff] }
 0x114   : > { %vm399_vm4 = vmor %vm397_vm3, %vm398_vm2 }
 0x115   : > { %v393_v35 = vmul.f32 %v2744_v33, %v392_v34 }
 0x117   : > { %v394_v36 = vmul.f32 0.5, %v393_v35 }
 0x119   : > { %v395_v38 = vsub.f32 1.5, %v394_v36 }
 0x11b   : > { %v396_v39 = vmul.f32 %v2744_v33, %v395_v38 }
 0x11d   : > { %v400_v41 = vsel %vm399_vm4, %v2744_v33, %v396_v39 }
 0x11e   : > { %v401_v43 = vmul.f32 %v400_v41, %v384_v11  ;;  %v2722_v11 = vld [vmem:[%s3455_s4 + $0x7] ss:$0 sm:$0xff] }
 0x120   : > { %v403_v44 = vmul.f32 %v402_v40, %v401_v43 }
 0x122   : > { %v3022_v45 = vadd.f32 %v404_v42, %v403_v44  ;;  %v2725_v44 = vld [vmem:[%s3455_s4 + $0xa] ss:$0 sm:$0xff] }
 0x124   : > { %v470_v46 = vpack.c.bf16 %v3022_v45, %v3022_v45 }
 0x126   : > { %2249 = vmatmul.msk.bf16.vlgmr.msra.gmra.mxu0 %vm372_vm0, %v470_v46  ;;  %2258 = vmatmul.msk.bf16.vlgmr.msra.gmra.mxu1 %vm372_vm0, %v470_v46 }
 0x127   : > { %2267 = vmatmul.msk.bf16.vlgmr.msra.gmra.mxu2 %vm372_vm0, %v470_v46  ;;  %2276 = vmatmul.msk.bf16.vlgmr.msra.gmra.mxu3 %vm372_vm0, %v470_v46 }
 0x128   : > { %728 = vmatpush.bf16.msra.mxu0 %v2632_v47  ;;  %753 = vmatpush.bf16.msra.mxu1 %v2634_v48 }
 0x129   : > { %778 = vmatpush.bf16.msra.mxu2 %v2636_v49  ;;  %803 = vmatpush.bf16.msra.mxu3 %v2638_v50 }
 0x12c   : > { %729 = vmatpush.bf16.msra.mxu0 %v2631_v51  ;;  %754 = vmatpush.bf16.msra.mxu1 %v2633_v52 }
 0x12d   : > { %779 = vmatpush.bf16.msra.mxu2 %v2635_v53  ;;  %804 = vmatpush.bf16.msra.mxu3 %v2637_v54 }
 0x136   : > { %2285 = vmatmul.msk.bf16.vlgmr.msrb.gmra.mxu0 %vm372_vm0, %v470_v46  ;;  %2294 = vmatmul.msk.bf16.vlgmr.msrb.gmra.mxu1 %vm372_vm0, %v470_v46 }
 0x137   : > { %2303 = vmatmul.msk.bf16.vlgmr.msrb.gmra.mxu2 %vm372_vm0, %v470_v46  ;;  %2312 = vmatmul.msk.bf16.vlgmr.msrb.gmra.mxu3 %vm372_vm0, %v470_v46 }
 0x146   : > { %2321 = vmatmul.msk.bf16.vlgmr.msra.gmra.mxu0 %vm372_vm0, %v470_v46  ;;  %2330 = vmatmul.msk.bf16.vlgmr.msra.gmra.mxu1 %vm372_vm0, %v470_v46 }
 0x147   : > { %2339 = vmatmul.msk.bf16.vlgmr.msra.gmra.mxu2 %vm372_vm0, %v470_v46  ;;  %2348 = vmatmul.msk.bf16.vlgmr.msra.gmra.mxu3 %vm372_vm0, %v470_v46  ;;  %v2726_v46 = vld [vmem:[%s3455_s4 + $0xb] ss:$0 sm:$0xff] }
 0x1a3   : > { %v507_v55 = vpop.f32.mrf.mxu0  ;;  %v532_v56 = vpop.f32.mrf.mxu1 }
 0x1a4   : > { %v508_v16 = vadd.f32 %v2715_v5, %v507_v55  ;;  %v533_v17 = vadd.f32 %v2716_v9, %v532_v56 }
 0x1a6   : > { %v810_v26 = vpack.c.bf16 %v508_v16, %v508_v16  ;;  %v811_v27 = vpack.c.bf16 %v533_v17, %v533_v17 }
 0x1aa   : > { %v557_v57 = vpop.f32.mrf.mxu2  ;;  %v582_v58 = vpop.f32.mrf.mxu3 }
 0x1ab   : > { %v509_v59 = vpop.f32.mrf.mxu0  ;;  %v534_v60 = vpop.f32.mrf.mxu1  ;;  %v558_v32 = vadd.f32 %v2717_v22, %v557_v57  ;;  %v583_v33 = vadd.f32 %v2718_v23, %v582_v58 }
 0x1ad   : > { %v812_v40 = vpack.c.bf16 %v558_v32, %v558_v32  ;;  %v813_v41 = vpack.c.bf16 %v583_v33, %v583_v33 }
 0x1b2   : > { %v559_v63 = vpop.f32.mrf.mxu2  ;;  %v584_v0 = vpop.f32.mrf.mxu3 }
 0x1b3   : > { %v619_v1 = vpop.f32.mrf.mxu0  ;;  %v644_v2 = vpop.f32.mrf.mxu1 }
 0x1b4   : > { %v620_v3 = vadd.f32 %v2719_v61, %v619_v1  ;;  %v645_v4 = vadd.f32 %v2720_v62, %v644_v2  ;;  %v406_v61 = vld [vmem:[%s368_s26] sm:$0x1]  ;;  %s359_s26 = sand.u32 1, %s2843_s14  }
 0x1b5   : > { %v407_v62 = vsub.f32 1.0, %v406_v61  ;;  %v1041_v61 = vld [vmem:[%s3456_s5 + $0x8] sm:$0xf]  ;;  %s2239_s25 = sshll.u32 %s359_s26, 3  ;;  %s2152_s17 = scalar_lea.sflag [#allocation3], %s359_s26 }
 0x1b6   : > { %v814_v6 = vpack.c.bf16 %v620_v3, %v620_v3  ;;  %v815_v7 = vpack.c.bf16 %v645_v4, %v645_v4  ;;  %s361_s11 = scalar_lea.vmem [#allocation2], %s2239_s25  ;;  %s2809_s25 = scalar_lea.hbm %s3461_s10, 16 }
 0x1b7   : > { %v408_v63 = vmul.f32 -1e+09, %v407_v62  ;;  %v1085_v62 = vsel %vm961_vm6, %v1041_v61, 0  ;;  %v2643_v61 = vld [vmem:[%s3459_s8 + $0x10] sm:$0xff]  ;;  %s2164_s12 = sshll.u32 %s361_s11, 4  ;;  %p2811_p1 = scmp.lt.s32.totalorder %s2809_s25, %s2805_s21  ;;  %s2165_s12 = int_to_ptr.vmem [resolvable:$true] %s2164_s12 }
 0x1b8   : > { %v823_v12 = vsel %vm818_vm5, %v814_v6, 0  ;;  %v842_v13 = vsel %vm818_vm5, %v815_v7, 0 }
 0x1b9   : > { %832 = vmatpush.bf16.xpose.msrb.mxu0 %v823_v12  ;;  %851 = vmatpush.bf16.xpose.msrb.mxu1 %v842_v13  ;;  %v3114_v0 = vperm.slane %v408_v63, 0  ;;  %v1040_v63 = vld [vmem:[%s3456_s5 + $0x4] sm:$0xf]  ;;  %p2812_p2 = por %p2811_p1, %p2810_p0 }
 0x1ba   : > { %v669_v14 = vpop.f32.mrf.mxu2  ;;  %v694_v15 = vpop.f32.mrf.mxu3 }
 0x1bb   : > { %v670_v18 = vadd.f32 %v2721_v10, %v669_v14  ;;  %v695_v19 = vadd.f32 %v2722_v11, %v694_v15  ;;  %v621_v20 = vpop.f32.mrf.mxu0  ;;  %v646_v21 = vpop.f32.mrf.mxu1  ;;  %p2813_p3 = pnand %p2812_p2, %p2808_p13 }
 0x1bd   : > { %v816_v24 = vpack.c.bf16 %v670_v18, %v670_v18  ;;  %v817_v25 = vpack.c.bf16 %v695_v19, %v695_v19 }
 0x1bf   : > { %v861_v28 = vsel %vm818_vm5, %v816_v24, 0  ;;  %v880_v29 = vsel %vm818_vm5, %v817_v25, 0 }
 0x1c0   : > { %870 = vmatpush.bf16.xpose.msrb.mxu2 %v861_v28  ;;  %889 = vmatpush.bf16.xpose.msrb.mxu3 %v880_v29 }
 0x1c1   : > { %2349 = vmatmul.msk.bf16.vlgmr.msrb.gmra.mxu0 %vm818_vm5, %v810_v26  ;;  %2350 = vmatmul.msk.bf16.vlgmr.msrb.gmra.mxu1 %vm818_vm5, %v811_v27 }
 0x1c2   : > { %v671_v34 = vpop.f32.mrf.mxu2  ;;  %v696_v35 = vpop.f32.mrf.mxu3 }
 0x1c3   : > { %v731_v36 = vpop.f32.mrf.mxu0  ;;  %v756_v37 = vpop.f32.mrf.mxu1 }
 0x1c4   : > { %v732_v38 = vadd.f32 %v2723_v30, %v731_v36  ;;  %v757_v39 = vadd.f32 %v2724_v31, %v756_v37 }
 0x1c6   : > { %v954_v42 = vpack.c.bf16 %v732_v38, %v732_v38  ;;  %v955_v43 = vpack.c.bf16 %v757_v39, %v757_v39 }
 0x1c7   : > { %2351 = vmatmul.msk.bf16.vlgmr.msrb.gmra.mxu2 %vm818_vm5, %v812_v40  ;;  %2352 = vmatmul.msk.bf16.vlgmr.msrb.gmra.mxu3 %vm818_vm5, %v813_v41 }
 0x1c8   : > { %v963_v47 = vsel %vm961_vm6, %v954_v42, 0  ;;  %v982_v48 = vsel %vm961_vm6, %v955_v43, 0 }
 0x1c9   : > { %972 = vmatpush.bf16.msra.mxu0 %v963_v47  ;;  %991 = vmatpush.bf16.msra.mxu1 %v982_v48 }
 0x1ca   : > { %v781_v49 = vpop.f32.mrf.mxu2  ;;  %v806_v50 = vpop.f32.mrf.mxu3 }
 0x1cb   : > { %v782_v51 = vadd.f32 %v2725_v44, %v781_v49  ;;  %v807_v52 = vadd.f32 %v2726_v46, %v806_v50  ;;  %v733_v53 = vpop.f32.mrf.mxu0  ;;  %v758_v54 = vpop.f32.mrf.mxu1 }
 0x1cd   : > { %v956_v55 = vpack.c.bf16 %v782_v51, %v782_v51  ;;  %v957_v56 = vpack.c.bf16 %v807_v52, %v807_v52 }
 0x1cf   : > { %v1001_v57 = vsel %vm961_vm6, %v956_v55, 0  ;;  %v1020_v58 = vsel %vm961_vm6, %v957_v56, 0 }
 0x1d0   : > { %1010 = vmatpush.bf16.msra.mxu2 %v1001_v57  ;;  %1029 = vmatpush.bf16.msra.mxu3 %v1020_v58 }
 0x1d2   : > { %v783_v59 = vpop.f32.mrf.mxu2  ;;  %v808_v60 = vpop.f32.mrf.mxu3 }
 0x1d3   : > { %v1039_v59 = vld [vmem:[%s3456_s5] sm:$0xf] }
 0x1d4   : > { %v1047_v60 = vsel %vm961_vm6, %v1039_v59, 0  ;;  %1094 = vmatpush.bf16.msrb.mxu2 %v1085_v62  ;;  %v2642_v62 = vld [vmem:[%s3459_s8 + $0x8] sm:$0xff] }
 0x1d5   : > { %1056 = vmatpush.bf16.msrb.mxu0 %v1047_v60  ;;  %v2644_v60 = vld [vmem:[%s3459_s8 + $0x18] sm:$0xff] }
 0x23e   : > { %v834_v1 = vpop.f32.mrf.mxu0  ;;  %v853_v2 = vpop.f32.mrf.mxu1 }
 0x23f   : > { %v895_v3 = vmul.f32 0.35355338, %v834_v1  ;;  %v896_v5 = vmul.f32 0.35355338, %v853_v2  ;;  %v1066_v1 = vsel %vm961_vm6, %v1040_v63, 0  ;;  %v2641_v63 = vld [vmem:[%s3459_s8] sm:$0xff] }
 0x240   : > { %1075 = vmatpush.bf16.msrb.mxu1 %v1066_v1  ;;  %v1042_v2 = vld [vmem:[%s3456_s5 + $0xc] sm:$0xf]  ;;  %v2727_v1 = vld [vmem:[%s3458_s7] ss:$0 sm:$0xff] }
 0x241   : > { %v902_v4 = vadd.f32 %v3114_v0, %v895_v3  ;;  %v903_v10 = vadd.f32 %v3114_v0, %v896_v5  ;;  %v1104_v3 = vsel %vm961_vm6, %v1042_v2, 0 }
 0x242   : > { %1113 = vmatpush.bf16.msrb.mxu3 %v1104_v3 }
 0x243   : > { %v906_v6 = vsel %vm818_vm5, %v902_v4, -inf  ;;  %v909_v14 = vsel %vm818_vm5, %v903_v10, -inf }
 0x244   : > { %907 = vmax.xlane.f32.xlu2 %v906_v6 }
 0x246   : > { %v836_v7 = vpop.f32.mrf.mxu0  ;;  %v855_v9 = vpop.f32.mrf.mxu1 }
 0x24a   : > { %v872_v11 = vpop.f32.mrf.mxu2  ;;  %v891_v12 = vpop.f32.mrf.mxu3 }
 0x24b   : > { %v897_v13 = vmul.f32 0.35355338, %v872_v11  ;;  %v898_v16 = vmul.f32 0.35355338, %v891_v12 }
 0x24c   : > { %910 = vmax.xlane.f32.xlu2 %v909_v14 }
 0x24d   : > { %v904_v15 = vadd.f32 %v3114_v0, %v897_v13  ;;  %v905_v20 = vadd.f32 %v3114_v0, %v898_v16 }
 0x24f   : > { %v912_v17 = vsel %vm818_vm5, %v904_v15, -inf  ;;  %v915_v21 = vsel %vm818_vm5, %v905_v20, -inf }
 0x250   : > { %913 = vmax.xlane.f32.xlu1 %v912_v17 }
 0x252   : > { %v874_v18 = vpop.f32.mrf.mxu2  ;;  %v893_v19 = vpop.f32.mrf.mxu3 }
 0x258   : > { %916 = vmax.xlane.f32.xlu1 %v915_v21 }
 0x2b7   : > { %v908_v22 = vpop.xlane.xlu2 %907 }
 0x2b8   : > { %v918_v23 = vsub.f32 %v902_v4, %v908_v22 }
 0x2ba   : > { %v922_v24 = vmul.f32 1.442695, %v918_v23 }
 0x2bc   : > { %2745 = vpow2.f32 %v922_v24 }
 0x2bf   : > { %v911_v26 = vpop.xlane.xlu2 %910 }
 0x2c0   : > { %v919_v30 = vsub.f32 %v903_v10, %v911_v26 }
 0x2c2   : > { %v2746_v25 = vpop.eup %2745  ;;  %v924_v32 = vmul.f32 1.442695, %v919_v30 }
 0x2c3   : > { %v914_v27 = vpop.xlane.xlu1 %913  ;;  %v930_v28 = vsel %vm818_vm5, %v2746_v25, 0.0 }
 0x2c4   : > { %v920_v29 = vsub.f32 %v904_v15, %v914_v27  ;;  %931 = vadd.xlane.f32.xlu2 %v930_v28 }
 0x2c6   : > { %v926_v31 = vmul.f32 1.442695, %v920_v29 }
 0x2c8   : > { %2747 = vpow2.f32 %v926_v31 }
 0x2c9   : > { %2749 = vpow2.f32 %v924_v32 }
 0x2cb   : > { %v917_v33 = vpop.xlane.xlu1 %916 }
 0x2cc   : > { %v921_v34 = vsub.f32 %v905_v20, %v917_v33 }
 0x2ce   : > { %v2748_v35 = vpop.eup %2747  ;;  %v928_v36 = vmul.f32 1.442695, %v921_v34 }
 0x2cf   : > { %v936_v37 = vsel %vm818_vm5, %v2748_v35, 0.0  ;;  %v2750_v38 = vpop.eup %2749 }
 0x2d0   : > { %2751 = vpow2.f32 %v928_v36  ;;  %937 = vadd.xlane.f32.xlu0 %v936_v37  ;;  %v933_v41 = vsel %vm818_vm5, %v2750_v38, 0.0 }
 0x2d6   : > { %v2752_v39 = vpop.eup %2751 }
 0x2d7   : > { %v939_v40 = vsel %vm818_vm5, %v2752_v39, 0.0 }
 0x2d8   : > { %940 = vadd.xlane.f32.xlu1 %v939_v40  ;;  %934 = vadd.xlane.f32.xlu0 %v933_v41 }
 0x337   : > { %v932_v42 = vpop.xlane.xlu2 %931 }
 0x338   : > { %2753 = vrcp.f32 %v932_v42  ;;  %v2640_v42 = vld [vmem:[%s3457_s6 + $0x8] sm:$0xff] }
 0x33e   : > { %v2754_v43 = vpop.eup %2753 }
 0x33f   : > { %v946_v44 = vmul.f32 %v2754_v43, %v2746_v25  ;;  %v3158_v25 = vld [vmem:[%s3460_s9] sm:$0xff] }
 0x340   : > { %v1126_v30 = vperm.slane %v3158_v25, 0 }
 0x341   : > { %v950_v46 = vpack.c.bf16 %v946_v44, %v946_v44 }
 0x343   : > { %v938_v47 = vpop.xlane.xlu0 %937  ;;  %2353 = vmatmul.msk.bf16.vlgmr.msra.gmra.mxu0 %vm818_vm5, %v950_v46 }
 0x344   : > { %2755 = vrcp.f32 %v938_v47  ;;  %1185 = vmatpush.bf16.msra.mxu0 %v2640_v42  ;;  %v2653_v42 = vld [vmem:[%s3454_s3 + $0x100] sm:$0xff] }
 0x34a   : > { %v2756_v48 = vpop.eup %2755 }
 0x34b   : > { %v948_v49 = vmul.f32 %v2756_v48, %v2748_v35  ;;  %v941_v50 = vpop.xlane.xlu1 %940  ;;  %v935_v51 = vpop.xlane.xlu0 %934 }
 0x34c   : > { %2757 = vrcp.f32 %v941_v50 }
 0x34d   : > { %v952_v52 = vpack.c.bf16 %v948_v49, %v948_v49  ;;  %2759 = vrcp.f32 %v935_v51 }
 0x34f   : > { %2355 = vmatmul.msk.bf16.vlgmr.msra.gmra.mxu2 %vm818_vm5, %v952_v52 }
 0x352   : > { %v2758_v53 = vpop.eup %2757 }
 0x353   : > { %v2760_v54 = vpop.eup %2759  ;;  %v949_v55 = vmul.f32 %v2758_v53, %v2752_v39  ;;  %v1151_v53 = vperm.slane %v3158_v25, 2 }
 0x354   : > { %v947_v56 = vmul.f32 %v2760_v54, %v2750_v38 }
 0x355   : > { %v953_v57 = vpack.c.bf16 %v949_v55, %v949_v55  ;;  %v1153_v55 = vperm.slane %v3158_v25, 3 }
 0x356   : > { %v951_v58 = vpack.c.bf16 %v947_v56, %v947_v56 }
 0x357   : > { %2356 = vmatmul.msk.bf16.vlgmr.msra.gmra.mxu3 %vm818_vm5, %v953_v57 }
 0x358   : > { %2354 = vmatmul.msk.bf16.vlgmr.msra.gmra.mxu1 %vm818_vm5, %v951_v58 }
 0x359   : > { %1243 = vmatpush.bf16.msra.mxu1 %v2644_v60  ;;  %v2662_v60 = vld [vmem:[%s3454_s3 + $0x148] sm:$0xff] }
 0x35d   : > { %1244 = vmatpush.bf16.msra.mxu1 %v2643_v61  ;;  %v2664_v61 = vld [vmem:[%s3454_s3 + $0x158] sm:$0xff] }
 0x361   : > { %1245 = vmatpush.bf16.msra.mxu1 %v2642_v62  ;;  %v2666_v62 = vld [vmem:[%s3454_s3 + $0x168] sm:$0xff] }
 0x365   : > { %1246 = vmatpush.bf16.msra.mxu1 %v2641_v63  ;;  %v2661_v63 = vld [vmem:[%s3454_s3 + $0x140] sm:$0xff] }
 0x3c0   : > { %v974_v4 = vpop.f32.mrf.mxu0 }
 0x3c1   : > { %v1035_v5 = vpack.c.bf16 %v974_v4, %v974_v4 }
 0x3c3   : > { %2357 = vmatmul.msk.bf16.vlgmr.msrb.gmra.mxu0 %vm818_vm5, %v1035_v5 }
 0x3c8   : > { %v976_v6 = vpop.f32.mrf.mxu0 }
 0x3d2   : > { %v1012_v7 = vpop.f32.mrf.mxu2 }
 0x3d3   : > { %v1037_v9 = vpack.c.bf16 %v1012_v7, %v1012_v7 }
 0x3d5   : > { %v993_v10 = vpop.f32.mrf.mxu1  ;;  %2359 = vmatmul.msk.bf16.vlgmr.msrb.gmra.mxu2 %vm818_vm5, %v1037_v9 }
 0x3d6   : > { %v1036_v11 = vpack.c.bf16 %v993_v10, %v993_v10 }
 0x3d8   : > { %2358 = vmatmul.msk.bf16.vlgmr.msrb.gmra.mxu1 %vm818_vm5, %v1036_v11 }
 0x3da   : > { %v1014_v12 = vpop.f32.mrf.mxu2  ;;  %v1031_v13 = vpop.f32.mrf.mxu3 }
 0x3db   : > { %v1038_v14 = vpack.c.bf16 %v1031_v13, %v1031_v13 }
 0x3dd   : > { %v995_v15 = vpop.f32.mrf.mxu1  ;;  %2360 = vmatmul.msk.bf16.vlgmr.msrb.gmra.mxu3 %vm818_vm5, %v1038_v14 }
 0x3e2   : > { %v1033_v16 = vpop.f32.mrf.mxu3 }
 0x3e3   : > { %v1210_v16 = vperm.slane %v3158_v25, 1 }
 0x440   : > { %v1058_v17 = vpop.f32.mrf.mxu0 }
 0x441   : > { %v1119_v22 = vsel %vm372_vm0, %v1058_v17, 0.0 }
 0x448   : > { %v1060_v18 = vpop.f32.mrf.mxu0 }
 0x455   : > { %v1077_v19 = vpop.f32.mrf.mxu1 }
 0x456   : > { %v1120_v21 = vsel %vm372_vm0, %v1077_v19, 0.0 }
 0x457   : > { %v1121_v26 = vadd.f32 %v1120_v21, %v1119_v22 }
 0x458   : > { %v1096_v20 = vpop.f32.mrf.mxu2 }
 0x459   : > { %v1122_v23 = vsel %vm372_vm0, %v1096_v20, 0.0 }
 0x45a   : > { %v1123_v27 = vadd.f32 %v1122_v23, %v1121_v26 }
 0x45d   : > { %v1079_v24 = vpop.f32.mrf.mxu1 }
 0x460   : > { %v1098_v28 = vpop.f32.mrf.mxu2  ;;  %v1115_v29 = vpop.f32.mrf.mxu3 }
 0x461   : > { %v1124_v31 = vsel %vm372_vm0, %v1115_v29, 0.0  ;;  %v2646_v28 = vld [vmem:[%s3454_s3 + $0xc8] sm:$0xff]  ;;  %v2648_v29 = vld [vmem:[%s3454_s3 + $0xd8] sm:$0xff] }
 0x462   : > { %v1125_v32 = vadd.f32 %v1124_v31, %v1123_v27  ;;  %v2652_v31 = vld [vmem:[%s3454_s3 + $0xf8] sm:$0xff]  ;;  %1377 = vmatpush.bf16.msra.mxu2 %v2646_v28  ;;  %1402 = vmatpush.bf16.msra.mxu3 %v2648_v29 }
 0x463   : > { %1452 = vmatpush.bf16.msrb.mxu1 %v2652_v31 }
 0x464   : > { %v1127_v33 = vadd.f32 %v1126_v30, %v1125_v32  ;;  %v2650_v30 = vld [vmem:[%s3454_s3 + $0xe8] sm:$0xff]  ;;  %v2645_v32 = vld [vmem:[%s3454_s3 + $0xc0] sm:$0xff] }
 0x466   : > { %v1128_v34 = vadd.f32 %v1127_v33, %v3022_v45  ;;  %v2639_v45 = vld [vmem:[%s3457_s6] sm:$0xff]  ;;  %v2647_v33 = vld [vmem:[%s3454_s3 + $0xd0] sm:$0xff]  ;;  %1378 = vmatpush.bf16.msra.mxu2 %v2645_v32 }
 0x467   : > { %1186 = vmatpush.bf16.msra.mxu0 %v2639_v45  ;;  %1403 = vmatpush.bf16.msra.mxu3 %v2647_v33  ;;  %v2655_v45 = vld [vmem:[%s3454_s3 + $0x110] sm:$0xff] }
 0x468   : > { %v1117_v35 = vpop.f32.mrf.mxu3  ;;  %v1129_v36 = vsel %vm372_vm0, %v1128_v34, 0.0 }
 0x469   : > { %1130 = vadd.xlane.f32.xlu1 %v1129_v36  ;;  %v2651_v35 = vld [vmem:[%s3454_s3 + $0xf0] sm:$0xff] }
 0x46a   : > { %1453 = vmatpush.bf16.msrb.mxu1 %v2651_v35  ;;  %v2731_v35 = vld [vmem:[%s3455_s4 + $0xd] ss:$0 sm:$0xff] }
 0x46b   : > { %1427 = vmatpush.bf16.msrb.mxu0 %v2650_v30 }
 0x4dc   : > { %v1131_v37 = vpop.xlane.xlu1 %1130 }
 0x4dd   : > { %v1132_v38 = vmul.f32 %v1131_v37, %v2966_v8  ;;  %v2654_v37 = vld [vmem:[%s3454_s3 + $0x108] sm:$0xff] }
 0x4de   : > { %1489 = vmatpush.bf16.msrb.mxu2 %v2654_v37 }
 0x4df   : > { %v1133_v39 = vsub.f32 %v1128_v34, %v1132_v38  ;;  %v2649_v34 = vld [vmem:[%s3454_s3 + $0xe0] sm:$0xff]  ;;  %v2656_v38 = vld [vmem:[%s3454_s3 + $0x118] sm:$0xff] }
 0x4e0   : > { %1428 = vmatpush.bf16.msrb.mxu0 %v2649_v34  ;;  %1514 = vmatpush.bf16.msrb.mxu3 %v2656_v38  ;;  %v2730_v34 = vld [vmem:[%s3455_s4 + $0xc] ss:$0 sm:$0xff] }
 0x4e1   : > { %v1134_v40 = vmul.f32 %v1133_v39, %v1133_v39 }
 0x4e2   : > { %1490 = vmatpush.bf16.msrb.mxu2 %v2653_v42 }
 0x4e3   : > { %v1135_v41 = vsel %vm372_vm0, %v1134_v40, 0.0 }
 0x4e4   : > { %1136 = vadd.xlane.f32.xlu2 %v1135_v41  ;;  %v2660_v41 = vld [vmem:[%s3454_s3 + $0x138] sm:$0xff]  ;;  %1515 = vmatpush.bf16.msrb.mxu3 %v2655_v45 }
 0x557   : > { %v1137_v43 = vpop.xlane.xlu2 %1136 }
 0x558   : > { %v1138_v44 = vmul.f32 %v1137_v43, %v2966_v8 }
 0x55a   : > { %v1139_v46 = vadd.f32 1e-12, %v1138_v44  ;;  %v2657_v44 = vld [vmem:[%s3454_s3 + $0x120] sm:$0xff] }
 0x55c   : > { %2761 = vrsqrt.f32 %v1139_v46  ;;  %vm1146_vm8 = vweird.f32 %v1139_v46 }
 0x562   : > { %v2762_v47 = vpop.eup %2761 }
 0x563   : > { %v1141_v48 = vmul.f32 %v2762_v47, %v1139_v46  ;;  %vm1147_vm7 = vweird.f32 %v2762_v47  ;;  %v2659_v46 = vld [vmem:[%s3454_s3 + $0x130] sm:$0xff] }
 0x564   : > { %vm1148_vm9 = vmor %vm1146_vm8, %vm1147_vm7 }
 0x565   : > { %v1142_v49 = vmul.f32 %v2762_v47, %v1141_v48 }
 0x567   : > { %v1143_v50 = vmul.f32 0.5, %v1142_v49 }
 0x569   : > { %v1144_v51 = vsub.f32 1.5, %v1143_v50 }
 0x56b   : > { %v1145_v52 = vmul.f32 %v2762_v47, %v1144_v51 }
 0x56d   : > { %v1149_v54 = vsel %vm1148_vm9, %v2762_v47, %v1145_v52 }
 0x56e   : > { %v1150_v56 = vmul.f32 %v1149_v54, %v1133_v39  ;;  %v2658_v39 = vld [vmem:[%s3454_s3 + $0x128] sm:$0xff] }
 0x570   : > { %v1152_v57 = vmul.f32 %v1151_v53, %v1150_v56  ;;  %v1275_v53 = vperm.slane %v3158_v25, 4 }
 0x572   : > { %v1154_v58 = vadd.f32 %v1153_v55, %v1152_v57  ;;  %v1277_v55 = vperm.slane %v3158_v25, 5  ;;  %v2668_v25 = vld [vmem:[%s3454_s3 + $0x178] sm:$0xff] }
 0x574   : > { %v1155_v59 = vpack.c.bf16 %v1154_v58, %v1154_v58 }
 0x576   : > { %2369 = vmatmul.msk.bf16.vlgmr.msra.gmra.mxu0 %vm372_vm0, %v1155_v59 }
 0x577   : > { %1539 = vmatpush.bf16.msra.mxu0 %v2658_v39 }
 0x57b   : > { %1540 = vmatpush.bf16.msra.mxu0 %v2657_v44 }
 0x5f3   : > { %v1188_v2 = vpop.f32.mrf.mxu0 }
 0x5f4   : > { %v1189_v3 = vadd.f32 %v2727_v1, %v1188_v2  ;;  %v2663_v1 = vld [vmem:[%s3454_s3 + $0x150] sm:$0xff]  ;;  %v2665_v2 = vld [vmem:[%s3454_s3 + $0x160] sm:$0xff] }
 0x5f6   : > { %v1193_v4 = vmul.f32 0.044715, %v1189_v3  ;;  %v1192_v12 = vmul.f32 0.5, %v1189_v3 }
 0x5f8   : > { %v1194_v5 = vmul.f32 %v1193_v4, %v1189_v3 }
 0x5fa   : > { %v1195_v6 = vmul.f32 %v1194_v5, %v1189_v3 }
 0x5fb   : > { %v1190_v7 = vpop.f32.mrf.mxu0 }
 0x5fc   : > { %v1196_v9 = vadd.f32 %v1195_v6, %v1189_v3  ;;  %v2667_v3 = vld [vmem:[%s3454_s3 + $0x170] sm:$0xff] }
 0x5fe   : > { %v1197_v10 = vmul.f32 0.7978846, %v1196_v9 }
 0x600   : > { %2763 = vtanh.f32 %v1197_v10 }
 0x606   : > { %v2764_v11 = vpop.eup %2763 }
 0x607   : > { %v1199_v13 = vadd.f32 1.0, %v2764_v11 }
 0x609   : > { %v1200_v14 = vmul.f32 %v1199_v13, %v1192_v12  ;;  %v2732_v13 = vld [vmem:[%s3455_s4 + $0x12] ss:$0 sm:$0xff] }
 0x60b   : > { %v1201_v15 = vpack.c.bf16 %v1200_v14, %v1200_v14  ;;  %v2733_v14 = vld [vmem:[%s3455_s4 + $0x13] ss:$0 sm:$0xff] }
 0x60d   : > { %2386 = vmatmul.msk.bf16.vlgmr.msra.gmra.mxu1 %vm1235_vm10, %v1201_v15 }
 0x60e   : > { %1564 = vmatpush.bf16.msra.mxu1 %v2660_v41 }
 0x612   : > { %1565 = vmatpush.bf16.msra.mxu1 %v2659_v46 }
 0x68a   : > { %v1248_v17 = vpop.f32.mrf.mxu1 }
 0x68b   : > { %v1249_v18 = vadd.f32 %v1248_v17, %v1210_v16 }
 0x68d   : > { %v1252_v19 = vadd.f32 %v1249_v18, %v1154_v58 }
 0x68f   : > { %v1253_v20 = vsel %vm372_vm0, %v1252_v19, 0.0 }
 0x690   : > { %1254 = vadd.xlane.f32.xlu0 %v1253_v20  ;;  %v2735_v20 = vld [vmem:[%s3455_s4 + $0x11] ss:$0 sm:$0xff] }
 0x692   : > { %v1250_v21 = vpop.f32.mrf.mxu1 }
 0x693   : > { %v2728_v21 = vld [vmem:[%s3455_s4 + $0xe] ss:$0 sm:$0xff] }
 0x703   : > { %v1255_v22 = vpop.xlane.xlu0 %1254 }
 0x704   : > { %v1256_v23 = vmul.f32 %v1255_v22, %v2966_v8  ;;  %v2729_v22 = vld [vmem:[%s3455_s4 + $0xf] ss:$0 sm:$0xff] }
 0x706   : > { %v1257_v24 = vsub.f32 %v1252_v19, %v1256_v23  ;;  %v2734_v19 = vld [vmem:[%s3455_s4 + $0x10] ss:$0 sm:$0xff] }
 0x708   : > { %v1258_v26 = vmul.f32 %v1257_v24, %v1257_v24 }
 0x70a   : > { %v1259_v27 = vsel %vm372_vm0, %v1258_v26, 0.0 }
 0x70b   : > { %1260 = vadd.xlane.f32.xlu1 %v1259_v27 }
 0x77e   : > { %v1261_v36 = vpop.xlane.xlu1 %1260 }
 0x77f   : > { %v1262_v40 = vmul.f32 %v1261_v36, %v2966_v8 }
 0x781   : > { %v1263_v43 = vadd.f32 1e-12, %v1262_v40 }
 0x783   : > { %2765 = vrsqrt.f32 %v1263_v43  ;;  %vm1270_vm12 = vweird.f32 %v1263_v43 }
 0x789   : > { %v2766_v47 = vpop.eup %2765 }
 0x78a   : > { %v1265_v48 = vmul.f32 %v2766_v47, %v1263_v43  ;;  %vm1271_vm11 = vweird.f32 %v2766_v47 }
 0x78b   : > { %vm1272_vm13 = vmor %vm1270_vm12, %vm1271_vm11 }
 0x78c   : > { %v1266_v49 = vmul.f32 %v2766_v47, %v1265_v48  ;;  %v2736_v48 = vld [vmem:[%s3455_s4 + $0x16] ss:$0 sm:$0xff] }
 0x78e   : > { %v1267_v50 = vmul.f32 0.5, %v1266_v49  ;;  %v2737_v49 = vld [vmem:[%s3455_s4 + $0x17] ss:$0 sm:$0xff] }
 0x790   : > { %v1268_v51 = vsub.f32 1.5, %v1267_v50 }
 0x792   : > { %v1269_v52 = vmul.f32 %v2766_v47, %v1268_v51 }
 0x794   : > { %v1273_v54 = vsel %vm1272_vm13, %v2766_v47, %v1269_v52 }
 0x795   : > { %v1274_v56 = vmul.f32 %v1273_v54, %v1257_v24 }
 0x797   : > { %v1276_v57 = vmul.f32 %v1275_v53, %v1274_v56  ;;  %v2738_v56 = vld [vmem:[%s3455_s4 + $0x14] ss:$0 sm:$0xff] }
 0x799   : > { %v3247_v58 = vadd.f32 %v1277_v55, %v1276_v57  ;;  %v2739_v57 = vld [vmem:[%s3455_s4 + $0x15] ss:$0 sm:$0xff] }
 0x79b   : > { %v1343_v59 = vpack.c.bf16 %v3247_v58, %v3247_v58 }
 0x79d   : > { %2456 = vmatmul.msk.bf16.vlgmr.msra.gmra.mxu2 %vm372_vm0, %v1343_v59  ;;  %2465 = vmatmul.msk.bf16.vlgmr.msra.gmra.mxu3 %vm372_vm0, %v1343_v59 }
 0x79e   : > { %2474 = vmatmul.msk.bf16.vlgmr.msrb.gmra.mxu0 %vm372_vm0, %v1343_v59  ;;  %2483 = vmatmul.msk.bf16.vlgmr.msrb.gmra.mxu1 %vm372_vm0, %v1343_v59 }
 0x79f   : > { %1601 = vmatpush.bf16.msra.mxu2 %v2662_v60  ;;  %1626 = vmatpush.bf16.msra.mxu3 %v2664_v61 }
 0x7a0   : > { %1651 = vmatpush.bf16.msrb.mxu0 %v2666_v62  ;;  %1676 = vmatpush.bf16.msrb.mxu1 %v2668_v25 }
 0x7a3   : > { %1602 = vmatpush.bf16.msra.mxu2 %v2661_v63  ;;  %1627 = vmatpush.bf16.msra.mxu3 %v2663_v1 }
 0x7a4   : > { %1652 = vmatpush.bf16.msrb.mxu0 %v2665_v2  ;;  %1677 = vmatpush.bf16.msrb.mxu1 %v2667_v3 }
 0x7ad   : > { %2492 = vmatmul.msk.bf16.vlgmr.msrb.gmra.mxu2 %vm372_vm0, %v1343_v59  ;;  %2501 = vmatmul.msk.bf16.vlgmr.msrb.gmra.mxu3 %vm372_vm0, %v1343_v59 }
 0x7ae   : > { %2510 = vmatmul.msk.bf16.vlgmr.msra.gmra.mxu0 %vm372_vm0, %v1343_v59  ;;  %2519 = vmatmul.msk.bf16.vlgmr.msra.gmra.mxu1 %vm372_vm0, %v1343_v59 }
 0x7bd   : > { %2528 = vmatmul.msk.bf16.vlgmr.msra.gmra.mxu2 %vm372_vm0, %v1343_v59  ;;  %2537 = vmatmul.msk.bf16.vlgmr.msra.gmra.mxu3 %vm372_vm0, %v1343_v59 }
 0x7be   : > { %2546 = vmatmul.msk.bf16.vlgmr.msrb.gmra.mxu0 %vm372_vm0, %v1343_v59  ;;  %2555 = vmatmul.msk.bf16.vlgmr.msrb.gmra.mxu1 %vm372_vm0, %v1343_v59 }
 0x81b   : > { %v1430_v4 = vpop.f32.mrf.mxu0  ;;  %v1455_v5 = vpop.f32.mrf.mxu1 }
 0x81c   : > { %v1431_v32 = vadd.f32 %v2728_v21, %v1430_v4  ;;  %v1456_v33 = vadd.f32 %v2729_v22, %v1455_v5 }
 0x81e   : > { %v1685_v42 = vpack.c.bf16 %v1431_v32, %v1431_v32  ;;  %v1686_v45 = vpack.c.bf16 %v1456_v33, %v1456_v33 }
 0x820   : > { %v1380_v6 = vpop.f32.mrf.mxu2  ;;  %v1405_v7 = vpop.f32.mrf.mxu3 }
 0x821   : > { %v1381_v43 = vadd.f32 %v2730_v34, %v1380_v6  ;;  %v1406_v44 = vadd.f32 %v2731_v35, %v1405_v7 }
 0x823   : > { %v1432_v9 = vpop.f32.mrf.mxu0  ;;  %v1457_v10 = vpop.f32.mrf.mxu1  ;;  %v1683_v50 = vpack.c.bf16 %v1381_v43, %v1381_v43  ;;  %v1684_v51 = vpack.c.bf16 %v1406_v44, %v1406_v44 }
 0x828   : > { %v1382_v11 = vpop.f32.mrf.mxu2  ;;  %v1407_v12 = vpop.f32.mrf.mxu3 }
 0x82b   : > { %v1542_v15 = vpop.f32.mrf.mxu0  ;;  %v1567_v16 = vpop.f32.mrf.mxu1 }
 0x82c   : > { %v1543_v17 = vadd.f32 %v2732_v13, %v1542_v15  ;;  %v1568_v18 = vadd.f32 %v2733_v14, %v1567_v16 }
 0x82e   : > { %v1689_v23 = vpack.c.bf16 %v1543_v17, %v1543_v17  ;;  %v1690_v24 = vpack.c.bf16 %v1568_v18, %v1568_v18 }
 0x830   : > { %v1733_v26 = vsel %vm818_vm5, %v1689_v23, 0  ;;  %v1752_v27 = vsel %vm818_vm5, %v1690_v24, 0  ;;  %v1492_v28 = vpop.f32.mrf.mxu2  ;;  %v1517_v29 = vpop.f32.mrf.mxu3 }
 0x831   : > { %v1493_v30 = vadd.f32 %v2734_v19, %v1492_v28  ;;  %v1518_v31 = vadd.f32 %v2735_v20, %v1517_v29  ;;  %1742 = vmatpush.bf16.xpose.msra.mxu0 %v1733_v26  ;;  %1761 = vmatpush.bf16.xpose.msra.mxu1 %v1752_v27 }
 0x833   : > { %v1687_v36 = vpack.c.bf16 %v1493_v30, %v1493_v30  ;;  %v1688_v37 = vpack.c.bf16 %v1518_v31, %v1518_v31  ;;  %v1544_v38 = vpop.f32.mrf.mxu0  ;;  %v1569_v39 = vpop.f32.mrf.mxu1 }
 0x835   : > { %v1695_v40 = vsel %vm818_vm5, %v1687_v36, 0  ;;  %v1714_v41 = vsel %vm818_vm5, %v1688_v37, 0 }
 0x836   : > { %1704 = vmatpush.bf16.xpose.msrb.mxu2 %v1695_v40  ;;  %1723 = vmatpush.bf16.xpose.msrb.mxu3 %v1714_v41 }
 0x838   : > { %2558 = vmatmul.msk.bf16.vlgmr.msra.gmra.mxu0 %vm818_vm5, %v1685_v42  ;;  %2559 = vmatmul.msk.bf16.vlgmr.msra.gmra.mxu1 %vm818_vm5, %v1686_v45  ;;  %v1494_v46 = vpop.f32.mrf.mxu2  ;;  %v1519_v47 = vpop.f32.mrf.mxu3 }
 0x83b   : > { %v1654_v52 = vpop.f32.mrf.mxu0  ;;  %v1679_v53 = vpop.f32.mrf.mxu1 }
 0x83c   : > { %v1655_v54 = vadd.f32 %v2736_v48, %v1654_v52  ;;  %v1680_v55 = vadd.f32 %v2737_v49, %v1679_v53 }
 0x83d   : > { %2556 = vmatmul.msk.bf16.vlgmr.msrb.gmra.mxu2 %vm818_vm5, %v1683_v50  ;;  %2557 = vmatmul.msk.bf16.vlgmr.msrb.gmra.mxu3 %vm818_vm5, %v1684_v51 }
 0x83e   : > { %v1825_v59 = vpack.c.bf16 %v1655_v54, %v1655_v54  ;;  %v1826_v60 = vpack.c.bf16 %v1680_v55, %v1680_v55 }
 0x840   : > { %v1869_v61 = vsel %vm961_vm6, %v1825_v59, 0  ;;  %v1888_v62 = vsel %vm961_vm6, %v1826_v60, 0  ;;  %v1604_v25 = vpop.f32.mrf.mxu2  ;;  %v1629_v63 = vpop.f32.mrf.mxu3 }
 0x841   : > { %v1605_v1 = vadd.f32 %v2738_v56, %v1604_v25  ;;  %v1630_v2 = vadd.f32 %v2739_v57, %v1629_v63  ;;  %1878 = vmatpush.bf16.msrb.mxu0 %v1869_v61  ;;  %1897 = vmatpush.bf16.msrb.mxu1 %v1888_v62 }
 0x843   : > { %v1823_v3 = vpack.c.bf16 %v1605_v1, %v1605_v1  ;;  %v1824_v4 = vpack.c.bf16 %v1630_v2, %v1630_v2  ;;  %v1656_v5 = vpop.f32.mrf.mxu0  ;;  %v1681_v6 = vpop.f32.mrf.mxu1 }
 0x844   : > { %v2566_v5 = vld [vmem:[%s3456_s5 + $0x18] sm:$0xf] }
 0x845   : > { %v1831_v7 = vsel %vm961_vm6, %v1823_v3, 0  ;;  %v1850_v9 = vsel %vm961_vm6, %v1824_v4, 0  ;;  %v1954_v6 = vsel %vm961_vm6, %v2566_v5, 0  ;;  %v2674_v5 = vld [vmem:[%s3459_s8 + $0x38] sm:$0xff] }
 0x846   : > { %1840 = vmatpush.bf16.msra.mxu2 %v1831_v7  ;;  %1859 = vmatpush.bf16.msra.mxu3 %v1850_v9  ;;  %v2564_v7 = vld [vmem:[%s3456_s5 + $0x10] sm:$0xf]  ;;  %v2565_v9 = vld [vmem:[%s3456_s5 + $0x14] sm:$0xf] }
 0x847   : > { %1963 = vmatpush.bf16.msra.mxu0 %v1954_v6  ;;  %v2673_v6 = vld [vmem:[%s3459_s8 + $0x30] sm:$0xff] }
 0x848   : > { %v1606_v10 = vpop.f32.mrf.mxu2  ;;  %v1631_v11 = vpop.f32.mrf.mxu3 }
 0x849   : > { %v1916_v10 = vsel %vm961_vm6, %v2564_v7, 0  ;;  %v1935_v11 = vsel %vm961_vm6, %v2565_v9, 0  ;;  %v2672_v7 = vld [vmem:[%s3459_s8 + $0x28] sm:$0xff]  ;;  %v2671_v9 = vld [vmem:[%s3459_s8 + $0x20] sm:$0xff] }
 0x84a   : > { %1925 = vmatpush.bf16.msrb.mxu2 %v1916_v10  ;;  %1944 = vmatpush.bf16.msrb.mxu3 %v1935_v11  ;;  %v2740_v10 = vld [vmem:[%s3458_s7 + $0x1] ss:$0 sm:$0xff] }
 0x8b5   : > { %v1744_v12 = vpop.f32.mrf.mxu0  ;;  %v1763_v13 = vpop.f32.mrf.mxu1 }
 0x8b6   : > { %v1769_v14 = vmul.f32 0.35355338, %v1744_v12  ;;  %v1770_v26 = vmul.f32 0.35355338, %v1763_v13  ;;  %v2567_v12 = vld [vmem:[%s3456_s5 + $0x1c] sm:$0xf] }
 0x8b7   : > { %v1973_v13 = vsel %vm961_vm6, %v2567_v12, 0 }
 0x8b8   : > { %v1773_v15 = vadd.f32 %v1769_v14, %v3114_v0  ;;  %v1774_v31 = vadd.f32 %v1770_v26, %v3114_v0  ;;  %1982 = vmatpush.bf16.msra.mxu1 %v1973_v13 }
 0x8ba   : > { %v1781_v16 = vsel %vm818_vm5, %v1773_v15, -inf  ;;  %v1784_v32 = vsel %vm818_vm5, %v1774_v31, -inf }
 0x8bb   : > { %1782 = vmax.xlane.f32.xlu1 %v1781_v16 }
 0x8bd   : > { %v1746_v17 = vpop.f32.mrf.mxu0  ;;  %v1765_v18 = vpop.f32.mrf.mxu1 }
 0x8c0   : > { %v1706_v19 = vpop.f32.mrf.mxu2  ;;  %v1725_v20 = vpop.f32.mrf.mxu3 }
 0x8c1   : > { %v1767_v21 = vmul.f32 0.35355338, %v1706_v19  ;;  %v1768_v22 = vmul.f32 0.35355338, %v1725_v20 }
 0x8c3   : > { %v1772_v23 = vadd.f32 %v1768_v22, %v3114_v0  ;;  %v1771_v24 = vadd.f32 %v1767_v21, %v3114_v0 }
 0x8c5   : > { %v1778_v27 = vsel %vm818_vm5, %v1772_v23, -inf  ;;  %v1775_v28 = vsel %vm818_vm5, %v1771_v24, -inf }
 0x8c6   : > { %1779 = vmax.xlane.f32.xlu0 %v1778_v27  ;;  %1776 = vmax.xlane.f32.xlu2 %v1775_v28 }
 0x8c8   : > { %v1708_v29 = vpop.f32.mrf.mxu2  ;;  %v1727_v30 = vpop.f32.mrf.mxu3 }
 0x8ce   : > { %1785 = vmax.xlane.f32.xlu2 %v1784_v32 }
 0x92e   : > { %v1783_v33 = vpop.xlane.xlu1 %1782 }
 0x92f   : > { %v1789_v34 = vsub.f32 %v1773_v15, %v1783_v33 }
 0x931   : > { %v1795_v35 = vmul.f32 1.442695, %v1789_v34  ;;  %v3376_v34 = vld [vmem:[%s3460_s9 + $0x8] sm:$0xff] }
 0x933   : > { %2767 = vpow2.f32 %v1795_v35 }
 0x939   : > { %v2768_v36 = vpop.eup %2767  ;;  %v1780_v37 = vpop.xlane.xlu0 %1779 }
 0x93a   : > { %v1777_v38 = vpop.xlane.xlu2 %1776  ;;  %v1788_v39 = vsub.f32 %v1772_v23, %v1780_v37  ;;  %v1805_v41 = vsel %vm818_vm5, %v2768_v36, 0.0 }
 0x93b   : > { %v1787_v40 = vsub.f32 %v1771_v24, %v1777_v38  ;;  %1806 = vadd.xlane.f32.xlu2 %v1805_v41 }
 0x93c   : > { %v1793_v42 = vmul.f32 1.442695, %v1788_v39  ;;  %v1995_v39 = vperm.slane %v3376_v34, 0 }
 0x93d   : > { %v1791_v45 = vmul.f32 1.442695, %v1787_v40 }
 0x93e   : > { %2769 = vpow2.f32 %v1793_v42 }
 0x93f   : > { %2771 = vpow2.f32 %v1791_v45 }
 0x942   : > { %v1786_v0 = vpop.xlane.xlu2 %1785 }
 0x943   : > { %v1790_v43 = vsub.f32 %v1774_v31, %v1786_v0 }
 0x944   : > { %v2770_v44 = vpop.eup %2769 }
 0x945   : > { %v1797_v46 = vmul.f32 1.442695, %v1790_v43  ;;  %v2772_v47 = vpop.eup %2771  ;;  %v1802_v48 = vsel %vm818_vm5, %v2770_v44, 0.0 }
 0x946   : > { %1803 = vadd.xlane.f32.xlu1 %v1802_v48  ;;  %v1799_v49 = vsel %vm818_vm5, %v2772_v47, 0.0 }
 0x947   : > { %2773 = vpow2.f32 %v1797_v46  ;;  %1800 = vadd.xlane.f32.xlu0 %v1799_v49 }
 0x94d   : > { %v2774_v50 = vpop.eup %2773 }
 0x94e   : > { %v1808_v51 = vsel %vm818_vm5, %v2774_v50, 0.0 }
 0x94f   : > { %1809 = vadd.xlane.f32.xlu0 %v1808_v51  ;;  %v2670_v51 = vld [vmem:[%s3457_s6 + $0x18] sm:$0xff] }
 0x9ae   : > { %v1807_v52 = vpop.xlane.xlu2 %1806 }
 0x9af   : > { %2775 = vrcp.f32 %v1807_v52 }
 0x9b5   : > { %v2776_v53 = vpop.eup %2775 }
 0x9b6   : > { %v1817_v54 = vmul.f32 %v2776_v53, %v2768_v36 }
 0x9b8   : > { %v1821_v55 = vpack.c.bf16 %v1817_v54, %v1817_v54 }
 0x9b9   : > { %v1804_v56 = vpop.xlane.xlu1 %1803 }
 0x9ba   : > { %2777 = vrcp.f32 %v1804_v56  ;;  %v1801_v57 = vpop.xlane.xlu0 %1800  ;;  %2562 = vmatmul.msk.bf16.vlgmr.msrb.gmra.mxu0 %vm818_vm5, %v1821_v55 }
 0x9bb   : > { %2779 = vrcp.f32 %v1801_v57 }
 0x9c0   : > { %v2778_v59 = vpop.eup %2777 }
 0x9c1   : > { %v2780_v60 = vpop.eup %2779  ;;  %v1816_v61 = vmul.f32 %v2778_v59, %v2770_v44 }
 0x9c2   : > { %v1815_v62 = vmul.f32 %v2780_v60, %v2772_v47  ;;  %v1810_v25 = vpop.xlane.xlu0 %1809 }
 0x9c3   : > { %v1820_v63 = vpack.c.bf16 %v1816_v61, %v1816_v61  ;;  %2781 = vrcp.f32 %v1810_v25 }
 0x9c4   : > { %v1819_v1 = vpack.c.bf16 %v1815_v62, %v1815_v62  ;;  %v2020_v62 = vperm.slane %v3376_v34, 2 }
 0x9c5   : > { %2561 = vmatmul.msk.bf16.vlgmr.msra.gmra.mxu3 %vm818_vm5, %v1820_v63  ;;  %v2022_v63 = vperm.slane %v3376_v34, 3 }
 0x9c6   : > { %2560 = vmatmul.msk.bf16.vlgmr.msra.gmra.mxu2 %vm818_vm5, %v1819_v1  ;;  %2114 = vmatpush.bf16.msra.mxu3 %v2674_v5 }
 0x9c7   : > { %2056 = vmatpush.bf16.msra.mxu2 %v2670_v51 }
 0x9c9   : > { %v2782_v2 = vpop.eup %2781 }
 0x9ca   : > { %v1818_v3 = vmul.f32 %v2782_v2, %v2774_v50  ;;  %2115 = vmatpush.bf16.msra.mxu3 %v2673_v6 }
 0x9cc   : > { %v1822_v4 = vpack.c.bf16 %v1818_v3, %v1818_v3 }
 0x9ce   : > { %2563 = vmatmul.msk.bf16.vlgmr.msrb.gmra.mxu1 %vm818_vm5, %v1822_v4  ;;  %2116 = vmatpush.bf16.msra.mxu3 %v2672_v7 }
 0x9d2   : > { %2117 = vmatpush.bf16.msra.mxu3 %v2671_v9 }
 0xa37   : > { %v1880_v14 = vpop.f32.mrf.mxu0 }
 0xa38   : > { %v1905_v15 = vpack.c.bf16 %v1880_v14, %v1880_v14 }
 0xa3a   : > { %2570 = vmatmul.msk.bf16.vlgmr.msra.gmra.mxu0 %vm818_vm5, %v1905_v15 }
 0xa3f   : > { %v1882_v16 = vpop.f32.mrf.mxu0 }
 0xa48   : > { %v1861_v17 = vpop.f32.mrf.mxu3 }
 0xa49   : > { %v1842_v18 = vpop.f32.mrf.mxu2  ;;  %v1904_v19 = vpack.c.bf16 %v1861_v17, %v1861_v17 }
 0xa4a   : > { %v1903_v20 = vpack.c.bf16 %v1842_v18, %v1842_v18 }
 0xa4b   : > { %v1899_v21 = vpop.f32.mrf.mxu1  ;;  %2569 = vmatmul.msk.bf16.vlgmr.msrb.gmra.mxu3 %vm818_vm5, %v1904_v19 }
 0xa4c   : > { %v1906_v22 = vpack.c.bf16 %v1899_v21, %v1899_v21  ;;  %2568 = vmatmul.msk.bf16.vlgmr.msrb.gmra.mxu2 %vm818_vm5, %v1903_v20 }
 0xa4e   : > { %2571 = vmatmul.msk.bf16.vlgmr.msra.gmra.mxu1 %vm818_vm5, %v1906_v22 }
 0xa50   : > { %v1863_v23 = vpop.f32.mrf.mxu3 }
 0xa51   : > { %v1844_v24 = vpop.f32.mrf.mxu2 }
 0xa52   : > { %v2082_v24 = vperm.slane %v3376_v34, 1 }
 0xa53   : > { %v1901_v26 = vpop.f32.mrf.mxu1 }
 0xab7   : > { %v1965_v27 = vpop.f32.mrf.mxu0 }
 0xab8   : > { %v1991_v36 = vsel %vm372_vm0, %v1965_v27, 0.0 }
 0xabf   : > { %v1967_v28 = vpop.f32.mrf.mxu0 }
 0xacb   : > { %v1984_v29 = vpop.f32.mrf.mxu1 }
 0xacc   : > { %v1993_v40 = vsel %vm372_vm0, %v1984_v29, 0.0 }
 0xace   : > { %v1946_v30 = vpop.f32.mrf.mxu3 }
 0xacf   : > { %v1927_v31 = vpop.f32.mrf.mxu2  ;;  %v1989_v32 = vsel %vm372_vm0, %v1946_v30, 0.0 }
 0xad0   : > { %v1988_v33 = vsel %vm372_vm0, %v1927_v31, 0.0 }
 0xad1   : > { %v1990_v35 = vadd.f32 %v1989_v32, %v1988_v33 }
 0xad3   : > { %v1992_v37 = vadd.f32 %v1991_v36, %v1990_v35  ;;  %v1986_v38 = vpop.f32.mrf.mxu1 }
 0xad5   : > { %v1994_v41 = vadd.f32 %v1993_v40, %v1992_v37 }
 0xad6   : > { %v1948_v42 = vpop.f32.mrf.mxu3 }
 0xad7   : > { %v1929_v45 = vpop.f32.mrf.mxu2  ;;  %v1996_v0 = vadd.f32 %v1995_v39, %v1994_v41 }
 0xad9   : > { %v1997_v43 = vadd.f32 %v1996_v0, %v3247_v58  ;;  %v2669_v58 = vld [vmem:[%s3457_s6 + $0x10] sm:$0xff] }
 0xada   : > { %2057 = vmatpush.bf16.msra.mxu2 %v2669_v58 }
 0xadb   : > { %v1998_v44 = vsel %vm372_vm0, %v1997_v43, 0.0 }
 0xadc   : > { %1999 = vadd.xlane.f32.xlu1 %v1998_v44  ;;  %v2146_v44 = vperm.slane %v3376_v34, 4 }
 0xb4f   : > { %v2000_v46 = vpop.xlane.xlu1 %1999 }
 0xb50   : > { %v2001_v47 = vmul.f32 %v2000_v46, %v2966_v8 }
 0xb52   : > { %v2002_v48 = vsub.f32 %v1997_v43, %v2001_v47  ;;  %v2148_v47 = vperm.slane %v3376_v34, 5 }
 0xb54   : > { %v2003_v49 = vmul.f32 %v2002_v48, %v2002_v48 }
 0xb56   : > { %v2004_v50 = vsel %vm372_vm0, %v2003_v49, 0.0 }
 0xb57   : > { %2005 = vadd.xlane.f32.xlu2 %v2004_v50 }
 0xbca   : > { %v2006_v52 = vpop.xlane.xlu2 %2005 }
 0xbcb   : > { %v2007_v53 = vmul.f32 %v2006_v52, %v2966_v8 }
 0xbcd   : > { %v2008_v54 = vadd.f32 1e-12, %v2007_v53 }
 0xbcf   : > { %2783 = vrsqrt.f32 %v2008_v54  ;;  %vm2015_vm15 = vweird.f32 %v2008_v54 }
 0xbd5   : > { %v2784_v55 = vpop.eup %2783 }
 0xbd6   : > { %v2010_v56 = vmul.f32 %v2784_v55, %v2008_v54  ;;  %vm2016_vm14 = vweird.f32 %v2784_v55 }
 0xbd7   : > { %vm2017_vm1 = vmor %vm2015_vm15, %vm2016_vm14 }
 0xbd8   : > { %v2011_v57 = vmul.f32 %v2784_v55, %v2010_v56 }
 0xbda   : > { %v2012_v59 = vmul.f32 0.5, %v2011_v57 }
 0xbdc   : > { %v2013_v60 = vsub.f32 1.5, %v2012_v59 }
 0xbde   : > { %v2014_v61 = vmul.f32 %v2784_v55, %v2013_v60 }
 0xbe0   : > { %v2018_v25 = vsel %vm2017_vm1, %v2784_v55, %v2014_v61 }
 0xbe1   : > { %v2019_v1 = vmul.f32 %v2018_v25, %v2002_v48 }
 0xbe3   : > { %v2021_v2 = vmul.f32 %v2020_v62, %v2019_v1 }
 0xbe5   : > { %v2023_v3 = vadd.f32 %v2022_v63, %v2021_v2 }
 0xbe7   : > { %v2024_v4 = vpack.c.bf16 %v2023_v3, %v2023_v3 }
 0xbe9   : > { %2585 = vmatmul.msk.bf16.vlgmr.msra.gmra.mxu2 %vm372_vm0, %v2024_v4 }
 0xc6c   : > { %v2059_v11 = vpop.f32.mrf.mxu2 }
 0xc6d   : > { %v2060_v12 = vadd.f32 %v2740_v10, %v2059_v11 }
 0xc6f   : > { %v2064_v13 = vmul.f32 0.044715, %v2060_v12  ;;  %v2063_v20 = vmul.f32 0.5, %v2060_v12 }
 0xc71   : > { %v2065_v14 = vmul.f32 %v2064_v13, %v2060_v12 }
 0xc73   : > { %v2066_v15 = vmul.f32 %v2065_v14, %v2060_v12 }
 0xc74   : > { %v2061_v16 = vpop.f32.mrf.mxu2 }
 0xc75   : > { %v2067_v17 = vadd.f32 %v2066_v15, %v2060_v12 }
 0xc77   : > { %v2068_v18 = vmul.f32 0.7978846, %v2067_v17 }
 0xc79   : > { %2785 = vtanh.f32 %v2068_v18 }
 0xc7f   : > { %v2786_v19 = vpop.eup %2785 }
 0xc80   : > { %v2070_v21 = vadd.f32 1.0, %v2786_v19 }
 0xc82   : > { %v2071_v22 = vmul.f32 %v2070_v21, %v2063_v20 }
 0xc84   : > { %v2072_v23 = vpack.c.bf16 %v2071_v22, %v2071_v22 }
 0xc86   : > { %2610 = vmatmul.msk.bf16.vlgmr.msra.gmra.mxu3 %vm1235_vm10, %v2072_v23 }
 0xd09   : > { %v2119_v26 = vpop.f32.mrf.mxu3 }
 0xd0a   : > { %v2120_v27 = vadd.f32 %v2119_v26, %v2082_v24 }
 0xd0c   : > { %v2123_v28 = vadd.f32 %v2120_v27, %v2023_v3 }
 0xd0e   : > { %v2124_v29 = vsel %vm372_vm0, %v2123_v28, 0.0 }
 0xd0f   : > { %2125 = vadd.xlane.f32.xlu0 %v2124_v29 }
 0xd11   : > { %v2121_v30 = vpop.f32.mrf.mxu3 }
 0xd82   : > { %v2126_v31 = vpop.xlane.xlu0 %2125 }
 0xd83   : > { %v2127_v32 = vmul.f32 %v2126_v31, %v2966_v8 }
 0xd85   : > { %v2128_v33 = vsub.f32 %v2123_v28, %v2127_v32 }
 0xd87   : > { %v2129_v35 = vmul.f32 %v2128_v33, %v2128_v33 }
 0xd89   : > { %v2130_v36 = vsel %vm372_vm0, %v2129_v35, 0.0 }
 0xd8a   : > { %2131 = vadd.xlane.f32.xlu1 %v2130_v36 }
 0xdfd   : > { %v2132_v37 = vpop.xlane.xlu1 %2131 }
 0xdfe   : > { %v2133_v38 = vmul.f32 %v2132_v37, %v2966_v8 }
 0xe00   : > { %v2134_v39 = vadd.f32 1e-12, %v2133_v38 }
 0xe02   : > { %2787 = vrsqrt.f32 %v2134_v39  ;;  %vm2141_vm3 = vweird.f32 %v2134_v39 }
 0xe08   : > { %v2788_v40 = vpop.eup %2787 }
 0xe09   : > { %v2136_v41 = vmul.f32 %v2788_v40, %v2134_v39  ;;  %vm2142_vm2 = vweird.f32 %v2788_v40 }
 0xe0a   : > { %vm2143_vm4 = vmor %vm2141_vm3, %vm2142_vm2 }
 0xe0b   : > { %v2137_v42 = vmul.f32 %v2788_v40, %v2136_v41 }
 0xe0d   : > { %v2138_v45 = vmul.f32 0.5, %v2137_v42 }
 0xe0f   : > { %v2139_v0 = vsub.f32 1.5, %v2138_v45 }
 0xe11   : > { %v2140_v43 = vmul.f32 %v2788_v40, %v2139_v0 }
 0xe13   : > { %v2144_v8 = vsel %vm2143_vm4, %v2788_v40, %v2140_v43 }
 0xe14   : > { %v2145_v46 = vmul.f32 %v2144_v8, %v2128_v33 }
 0xe16   : > { %v2147_v48 = vmul.f32 %v2146_v44, %v2145_v46 }
 0xe18   : > { %v2149_v49 = vadd.f32 %v2148_v47, %v2147_v48 }
 0xe1a   : > { %2150 = vst.msk [vmem:[%s361_s11] sm:$0xff] %vm372_vm0, %v2149_v49 }
 0xe1b   : > { %2816 = shalt.err (!%p2813_p3)
}
 0xe1c   : > { %2675 = dma.vmem_to_hbm [thread:$0]  (%p2947_p5), %s2165_s12, 128, %s2167_s18, %s2152_s17  }
 0xe1d PF: > { %p2681_p4 = scmp.ge.s32.totalorder %s2851_s16, 2  ;;  %s2178_s26 = sand.u32 1, %s2839_s13  }
 0xe1e   : > { %s2179_s11 = scalar_lea.sflag [#allocation3], %s2178_s26 }
 0xe1f   : > { %p2678_p7 = pnand %p2681_p4, %p2951_p6 }
 0xe21   : > { %p2679_p8 = pneg %p2678_p7 }
 0xe23   : > { %2834 = dma.done.wait (%p2679_p8), %s2179_s11, 128  }
 0xe24   : > { %2836 = vsyncadd (%p2679_p8), %s2179_s11, 4294967168  ;;  %p20_p9 = scmp.ge.s32.totalorder %s2934_s19, 4   ;;  %s3464_s13 = smov %s2843_s14 }
 0xe25   : > { %s3465_s14 = smov %s2847_s15  ;;  %s3466_s15 = smov %s2945_s22 }
 0xe26   : > { %s3467_s16 = smov %s2934_s19  ;;  %22 = sbr.rel (!%p20_p9) target bundleno = 3 (0x3), region = 105 }
 0xe2b   :  { %2185 = vsyncpa [#allocation3], 1 }
 0xe2c   :  { %2187 = vsyncpa [#allocation3 + $0x1], 1 }

</bundles_post_ra>
